<compile_context>
chip_gen: v5e
topology: v5e:2x2
jax: 0.10.0
libtpu: 0.0.40
codegen_flags: <defaults>
</compile_context>

<pallas_src>
import jax
import jax.numpy as jnp
from jax import lax
from jax.experimental import pallas as pl
from jax.experimental.pallas import tpu as pltpu

# ----------------------------- configuration --------------------------------
VOCAB = ['#UNK#', '#START#', '#END#', '#PAD#']
N_TOKENS = len(VOCAB)            # 4
EMB_SIZE = 128
LSTM_UNITS = 128                 # multiple of 128 -> lane aligned gate slices
CNN_FEATURE_SIZE = 256           # small stand-in for 2048
BATCH = 2
SEQ_LEN = 8
V_PAD = 128                      # lane-dense logits slab width


# ------------------------------ Pallas kernel --------------------------------
def caption_kernel(img_ref, emb_ref,
                   w_c0_ref, b_c0_ref, w_h0_ref, b_h0_ref,
                   w_ih_ref, w_hh_ref, bias_ref,
                   w_out_ref, b_out_ref,
                   logits_ref,
                   hs_scr):
    """Init linears + unrolled LSTM recurrence + batched output projection.

    img_ref    : [B, F]        bf16     emb_ref  : [T*B, E] bf16 (time-major)
    w_c0/w_h0  : [F, H]        bf16     b_c0/b_h0: [1, H]   f32
    w_ih       : [E, 4H]       bf16 (gate order i,f,o,g)
    w_hh       : [H, 4H]       bf16 (gate order i,f,o,g)
    bias       : [1, 4H]       f32  (b_ih + b_hh, reordered)
    w_out      : [H, V_PAD]    bf16 (zero padded)   b_out: [1, V_PAD] f32
    logits_ref : [T*B, V_PAD]  f32  (lane-dense output slab)
    hs_scr     : [T*B, H]      f32  VMEM scratch for per-step hidden states
    """
    B = img_ref.shape[0]
    TB = emb_ref.shape[0]
    T = TB // B
    H = w_hh_ref.shape[0]

    img = img_ref[...]                                    # [B, F] bf16

    # NB: reference feeds (cnn_to_c0(img), cnn_to_h0(img)) as (h0, c0).
    h = jnp.dot(img, w_c0_ref[...],
                preferred_element_type=jnp.float32) + b_c0_ref[...]   # [B, H] f32
    c = jnp.dot(img, w_h0_ref[...],
                preferred_element_type=jnp.float32) + b_h0_ref[...]   # [B, H] f32

    # Hoisted input-to-hidden projection for ALL timesteps (M = T*B).
    xg = jnp.dot(emb_ref[...], w_ih_ref[...],
                 preferred_element_type=jnp.float32) + bias_ref[...]  # [T*B, 4H] f32

    w_hh = w_hh_ref[...]                                  # [H, 4H] bf16

    # Static (unrolled) time loop: only the recurrent term is on the critical
    # path; h/c stay loop-carried in vregs (no VMEM round-trips).
    for t in range(T):
        g_pre = xg[t * B:(t + 1) * B, :] + jnp.dot(
            h.astype(jnp.bfloat16), w_hh,
            preferred_element_type=jnp.float32)           # [B, 4H] f32

        sig = jax.nn.sigmoid(g_pre[:, :3 * H])            # one EUP push: i,f,o
        i_g = sig[:, 0 * H:1 * H]
        f_g = sig[:, 1 * H:2 * H]
        o_g = sig[:, 2 * H:3 * H]
        g_g = jnp.tanh(g_pre[:, 3 * H:])                  # one EUP push: g

        c = f_g * c + i_g * g_g
        h = o_g * jnp.tanh(c)

        hs_scr[t * B:(t + 1) * B, :] = h                  # stash for batched proj

    # Single batched output projection + one lane-dense store.
    logits_ref[...] = jnp.dot(hs_scr[...].astype(jnp.bfloat16), w_out_ref[...],
                              preferred_element_type=jnp.float32) + b_out_ref[...]


# ------------------------------ wrapper / glue --------------------------------
def init_params(key, n_tokens=N_TOKENS, emb_size=EMB_SIZE,
                lstm_units=LSTM_UNITS, cnn_feature_size=CNN_FEATURE_SIZE):
    """Deterministic parameter init (weights stored pre-transposed: [in, out]).

    LSTM gate order here is the PyTorch order (i, f, g, o); the kernel wrapper
    reorders to (i, f, o, g) for the fused sigmoid/tanh path.
    """
    ks = jax.random.split(key, 12)

    def unif(k, shape, fan_in):
        bound = 1.0 / jnp.sqrt(jnp.float32(fan_in))
        return jax.random.uniform(k, shape, jnp.float32, -bound, bound)

    H, E, F, V = lstm_units, emb_size, cnn_feature_size, n_tokens
    params = dict(
        embedding=jax.random.normal(ks[0], (V, E), jnp.float32),
        w_c0=unif(ks[1], (F, H), F), b_c0=unif(ks[2], (1, H), F),
        w_h0=unif(ks[3], (F, H), F), b_h0=unif(ks[4], (1, H), F),
        w_ih=unif(ks[5], (E, 4 * H), H), b_ih=unif(ks[6], (1, 4 * H), H),
        w_hh=unif(ks[7], (H, 4 * H), H), b_hh=unif(ks[8], (1, 4 * H), H),
        w_out=unif(ks[9], (H, V), H), b_out=unif(ks[10], (1, V), H),
    )
    return params


def _reorder_gates(w):
    """[.., 4H] in PyTorch order (i,f,g,o) -> (i,f,o,g)."""
    H = w.shape[-1] // 4
    return jnp.concatenate([w[..., :2 * H], w[..., 3 * H:], w[..., 2 * H:3 * H]],
                           axis=-1)


@jax.jit
def caption_net_forward(image_vectors, captions_ix, params):
    """Forward pass. image_vectors: [B, F] f32, captions_ix: [B, T] int32.

    Returns logits [B, T, n_tokens] f32.
    """
    # Embedding lookup (gather) as plain-JAX glue.
    emb = jnp.take(params['embedding'], captions_ix, axis=0)      # [B, T, E]
    B, T, E = emb.shape
    H = params['w_hh'].shape[0]
    V = params['w_out'].shape[1]

    # Time-major flatten so per-step slices in the kernel are contiguous rows.
    emb_tb = jnp.swapaxes(emb, 0, 1).reshape(T * B, E).astype(jnp.bfloat16)

    # bf16 MXU inputs; gate columns reordered (i,f,o,g); biases stay f32.
    w_ih = _reorder_gates(params['w_ih']).astype(jnp.bfloat16)
    w_hh = _reorder_gates(params['w_hh']).astype(jnp.bfloat16)
    bias = _reorder_gates(params['b_ih'] + params['b_hh'])         # [1, 4H] f32

    # Lane-dense output: pad V -> V_PAD with zeros (sliced back in wrapper).
    w_out = jnp.zeros((H, V_PAD), jnp.bfloat16).at[:, :V].set(
        params['w_out'].astype(jnp.bfloat16))
    b_out = jnp.zeros((1, V_PAD), jnp.float32).at[:, :V].set(params['b_out'])

    img = image_vectors.astype(jnp.bfloat16)
    w_c0 = params['w_c0'].astype(jnp.bfloat16)
    w_h0 = params['w_h0'].astype(jnp.bfloat16)

    vmem = pl.BlockSpec(memory_space=pltpu.MemorySpace.VMEM)
    args = (img, emb_tb,
            w_c0, params['b_c0'], w_h0, params['b_h0'],
            w_ih, w_hh, bias, w_out, b_out)

    # Gridless: whole working set (~0.5 MiB) fits VMEM on v5e/v6e/v7x.
    # For non-trivial batch, add a grid over B with
    # dimension_semantics=("parallel",) to use both v7x TensorCores and tile
    # F for the init linears against the 64 MiB v7x VMEM.
    logits_flat = pl.pallas_call(
        caption_kernel,
        out_shape=jax.ShapeDtypeStruct((T * B, V_PAD), jnp.float32),
        in_specs=[vmem] * len(args),
        out_specs=vmem,
        scratch_shapes=[pltpu.VMEM((T * B, H), jnp.float32)],
    )(*args)

    # [T*B, V_PAD] -> [B, T, V]  (layout plumbing only)
    return jnp.swapaxes(logits_flat.reshape(T, B, V_PAD), 0, 1)[:, :, :V]


# ------------------------------ pure-JAX reference ---------------------------
def caption_net_reference(image_vectors, captions_ix, params):
    emb = jnp.take(params['embedding'], captions_ix, axis=0)      # [B, T, E]
    H = params['w_hh'].shape[0]

    h = image_vectors @ params['w_c0'] + params['b_c0']           # h0 <- cnn_to_c0
    c = image_vectors @ params['w_h0'] + params['b_h0']           # c0 <- cnn_to_h0
    bias = params['b_ih'] + params['b_hh']

    def step(carry, x_t):
        h, c = carry
        gates = x_t @ params['w_ih'] + h @ params['w_hh'] + bias  # PyTorch order i,f,g,o
        i = jax.nn.sigmoid(gates[:, 0 * H:1 * H])
        f = jax.nn.sigmoid(gates[:, 1 * H:2 * H])
        g = jnp.tanh(gates[:, 2 * H:3 * H])
        o = jax.nn.sigmoid(gates[:, 3 * H:4 * H])
        c = f * c + i * g
        h = o * jnp.tanh(c)
        return (h, c), h

    _, hs = lax.scan(step, (h, c), jnp.swapaxes(emb, 0, 1))       # [T, B, H]
    hs = jnp.swapaxes(hs, 0, 1)                                   # [B, T, H]
    return hs @ params['w_out'] + params['b_out']                 # [B, T, V]


# ----------------------------------- main ------------------------------------
if __name__ == "__main__":
    key = jax.random.PRNGKey(0)
    k_param, k_img, k_cap = jax.random.split(key, 3)

    params = init_params(k_param)
    image_vectors = jax.random.normal(k_img, (BATCH, CNN_FEATURE_SIZE), jnp.float32)
    captions_ix = jax.random.randint(k_cap, (BATCH, SEQ_LEN), 0, N_TOKENS, jnp.int32)

    logits = caption_net_forward(image_vectors, captions_ix, params)
    logits = jax.block_until_ready(logits)

    assert logits.shape == (BATCH, SEQ_LEN, N_TOKENS), logits.shape
    assert bool(jnp.all(jnp.isfinite(logits)))

    ref = caption_net_reference(image_vectors, captions_ix, params)
    # Tolerance covers bf16 MXU inputs with f32 accumulation.
    assert bool(jnp.allclose(logits, ref, atol=5e-2, rtol=5e-2)), (
        float(jnp.max(jnp.abs(logits - ref))))

    print("KERNEL_OK")
</pallas_src>

<mosaic_0001>
module attributes {stable_mosaic.version = 11 : i64} {
  func.func @caption_kernel(%arg0: memref<2x256xbf16, #tpu.memory_space<vmem>>, %arg1: memref<16x128xbf16, #tpu.memory_space<vmem>>, %arg2: memref<256x128xbf16, #tpu.memory_space<vmem>>, %arg3: memref<1x128xf32, #tpu.memory_space<vmem>>, %arg4: memref<256x128xbf16, #tpu.memory_space<vmem>>, %arg5: memref<1x128xf32, #tpu.memory_space<vmem>>, %arg6: memref<128x512xbf16, #tpu.memory_space<vmem>>, %arg7: memref<128x512xbf16, #tpu.memory_space<vmem>>, %arg8: memref<1x512xf32, #tpu.memory_space<vmem>>, %arg9: memref<128x128xbf16, #tpu.memory_space<vmem>>, %arg10: memref<1x128xf32, #tpu.memory_space<vmem>>, %arg11: memref<16x128xf32, #tpu.memory_space<vmem>>, %arg12: memref<16x128xf32, #tpu.memory_space<vmem>>) attributes {dimension_semantics = [], scalar_prefetch = 0 : i64, scratch_operands = 1 : i64, tpu.core_type = #tpu.core_type<tc>} {
    %c0 = arith.constant 0 : index
    %c0_0 = arith.constant 0 : index
    %0 = vector.load %arg0[%c0, %c0_0] : memref<2x256xbf16, #tpu.memory_space<vmem>>, vector<2x256xbf16>
    %c0_1 = arith.constant 0 : index
    %c0_2 = arith.constant 0 : index
    %1 = vector.load %arg2[%c0_1, %c0_2] : memref<256x128xbf16, #tpu.memory_space<vmem>>, vector<256x128xbf16>
    %cst = arith.constant dense<0.000000e+00> : vector<2x128xf32>
    %2 = tpu.matmul %0, %1, %cst {dimension_numbers = #tpu.dot_dimension_numbers<[1], [0], [0], [1], [0, 0, 1, 1], [], []>} : vector<2x256xbf16>, vector<256x128xbf16>, vector<2x128xf32> -> vector<2x128xf32>
    %c0_3 = arith.constant 0 : index
    %c0_4 = arith.constant 0 : index
    %3 = vector.load %arg3[%c0_3, %c0_4] : memref<1x128xf32, #tpu.memory_space<vmem>>, vector<1x128xf32>
    %4 = vector.broadcast %3 : vector<1x128xf32> to vector<2x128xf32>
    %5 = arith.addf %2, %4 : vector<2x128xf32>
    %c0_5 = arith.constant 0 : index
    %c0_6 = arith.constant 0 : index
    %6 = vector.load %arg4[%c0_5, %c0_6] : memref<256x128xbf16, #tpu.memory_space<vmem>>, vector<256x128xbf16>
    %cst_7 = arith.constant dense<0.000000e+00> : vector<2x128xf32>
    %7 = tpu.matmul %0, %6, %cst_7 {dimension_numbers = #tpu.dot_dimension_numbers<[1], [0], [0], [1], [0, 0, 1, 1], [], []>} : vector<2x256xbf16>, vector<256x128xbf16>, vector<2x128xf32> -> vector<2x128xf32>
    %c0_8 = arith.constant 0 : index
    %c0_9 = arith.constant 0 : index
    %8 = vector.load %arg5[%c0_8, %c0_9] : memref<1x128xf32, #tpu.memory_space<vmem>>, vector<1x128xf32>
    %9 = vector.broadcast %8 : vector<1x128xf32> to vector<2x128xf32>
    %10 = arith.addf %7, %9 : vector<2x128xf32>
    %c0_10 = arith.constant 0 : index
    %c0_11 = arith.constant 0 : index
    %11 = vector.load %arg1[%c0_10, %c0_11] : memref<16x128xbf16, #tpu.memory_space<vmem>>, vector<16x128xbf16>
    %c0_12 = arith.constant 0 : index
    %c0_13 = arith.constant 0 : index
    %12 = vector.load %arg6[%c0_12, %c0_13] : memref<128x512xbf16, #tpu.memory_space<vmem>>, vector<128x512xbf16>
    %cst_14 = arith.constant dense<0.000000e+00> : vector<16x512xf32>
    %13 = tpu.matmul %11, %12, %cst_14 {dimension_numbers = #tpu.dot_dimension_numbers<[1], [0], [0], [1], [0, 0, 1, 1], [], []>} : vector<16x128xbf16>, vector<128x512xbf16>, vector<16x512xf32> -> vector<16x512xf32>
    %c0_15 = arith.constant 0 : index
    %c0_16 = arith.constant 0 : index
    %14 = vector.load %arg8[%c0_15, %c0_16] : memref<1x512xf32, #tpu.memory_space<vmem>>, vector<1x512xf32>
    %15 = vector.broadcast %14 : vector<1x512xf32> to vector<16x512xf32>
    %16 = arith.addf %13, %15 : vector<16x512xf32>
    %c0_17 = arith.constant 0 : index
    %c0_18 = arith.constant 0 : index
    %17 = vector.load %arg7[%c0_17, %c0_18] : memref<128x512xbf16, #tpu.memory_space<vmem>>, vector<128x512xbf16>
    %18 = vector.extract_strided_slice %16 {offsets = [0, 0], sizes = [2, 512], strides = [1, 1]} : vector<16x512xf32> to vector<2x512xf32>
    %19 = arith.truncf %5 : vector<2x128xf32> to vector<2x128xbf16>
    %cst_19 = arith.constant dense<0.000000e+00> : vector<2x512xf32>
    %20 = tpu.matmul %19, %17, %cst_19 {dimension_numbers = #tpu.dot_dimension_numbers<[1], [0], [0], [1], [0, 0, 1, 1], [], []>} : vector<2x128xbf16>, vector<128x512xbf16>, vector<2x512xf32> -> vector<2x512xf32>
    %21 = arith.addf %18, %20 : vector<2x512xf32>
    %22 = vector.extract_strided_slice %21 {offsets = [0, 0], sizes = [2, 384], strides = [1, 1]} : vector<2x512xf32> to vector<2x384xf32>
    %23 = arith.negf %22 : vector<2x384xf32>
    %24 = math.exp %23 : vector<2x384xf32>
    %cst_20 = arith.constant 1.000000e+00 : f32
    %25 = vector.broadcast %cst_20 : f32 to vector<2x384xf32>
    %26 = arith.addf %25, %24 : vector<2x384xf32>
    %27 = arith.divf %25, %26 : vector<2x384xf32>
    %28 = vector.extract_strided_slice %27 {offsets = [0, 0], sizes = [2, 128], strides = [1, 1]} : vector<2x384xf32> to vector<2x128xf32>
    %29 = vector.extract_strided_slice %27 {offsets = [0, 128], sizes = [2, 128], strides = [1, 1]} : vector<2x384xf32> to vector<2x128xf32>
    %30 = vector.extract_strided_slice %27 {offsets = [0, 256], sizes = [2, 128], strides = [1, 1]} : vector<2x384xf32> to vector<2x128xf32>
    %31 = vector.extract_strided_slice %21 {offsets = [0, 384], sizes = [2, 128], strides = [1, 1]} : vector<2x512xf32> to vector<2x128xf32>
    %32 = math.tanh %31 : vector<2x128xf32>
    %33 = arith.mulf %29, %10 : vector<2x128xf32>
    %34 = arith.mulf %28, %32 : vector<2x128xf32>
    %35 = arith.addf %33, %34 : vector<2x128xf32>
    %36 = math.tanh %35 : vector<2x128xf32>
    %37 = arith.mulf %30, %36 : vector<2x128xf32>
    %c0_21 = arith.constant 0 : index
    %c0_22 = arith.constant 0 : index
    %38 = vector.load %arg12[%c0_21, %c0_22] : memref<16x128xf32, #tpu.memory_space<vmem>>, vector<2x128xf32>
    tpu.vector_store %arg12[%c0_21, %c0_22], %37 {strides = array<i32>} : memref<16x128xf32, #tpu.memory_space<vmem>>, vector<2x128xf32>,
    %39 = vector.extract_strided_slice %16 {offsets = [2, 0], sizes = [2, 512], strides = [1, 1]} : vector<16x512xf32> to vector<2x512xf32>
    %40 = arith.truncf %37 : vector<2x128xf32> to vector<2x128xbf16>
    %cst_23 = arith.constant dense<0.000000e+00> : vector<2x512xf32>
    %41 = tpu.matmul %40, %17, %cst_23 {dimension_numbers = #tpu.dot_dimension_numbers<[1], [0], [0], [1], [0, 0, 1, 1], [], []>} : vector<2x128xbf16>, vector<128x512xbf16>, vector<2x512xf32> -> vector<2x512xf32>
    %42 = arith.addf %39, %41 : vector<2x512xf32>
    %43 = vector.extract_strided_slice %42 {offsets = [0, 0], sizes = [2, 384], strides = [1, 1]} : vector<2x512xf32> to vector<2x384xf32>
    %44 = arith.negf %43 : vector<2x384xf32>
    %45 = math.exp %44 : vector<2x384xf32>
    %cst_24 = arith.constant 1.000000e+00 : f32
    %46 = vector.broadcast %cst_24 : f32 to vector<2x384xf32>
    %47 = arith.addf %46, %45 : vector<2x384xf32>
    %48 = arith.divf %46, %47 : vector<2x384xf32>
    %49 = vector.extract_strided_slice %48 {offsets = [0, 0], sizes = [2, 128], strides = [1, 1]} : vector<2x384xf32> to vector<2x128xf32>
    %50 = vector.extract_strided_slice %48 {offsets = [0, 128], sizes = [2, 128], strides = [1, 1]} : vector<2x384xf32> to vector<2x128xf32>
    %51 = vector.extract_strided_slice %48 {offsets = [0, 256], sizes = [2, 128], strides = [1, 1]} : vector<2x384xf32> to vector<2x128xf32>
    %52 = vector.extract_strided_slice %42 {offsets = [0, 384], sizes = [2, 128], strides = [1, 1]} : vector<2x512xf32> to vector<2x128xf32>
    %53 = math.tanh %52 : vector<2x128xf32>
    %54 = arith.mulf %50, %35 : vector<2x128xf32>
    %55 = arith.mulf %49, %53 : vector<2x128xf32>
    %56 = arith.addf %54, %55 : vector<2x128xf32>
    %57 = math.tanh %56 : vector<2x128xf32>
    %58 = arith.mulf %51, %57 : vector<2x128xf32>
    %c2 = arith.constant 2 : index
    %c0_25 = arith.constant 0 : index
    %59 = vector.load %arg12[%c2, %c0_25] : memref<16x128xf32, #tpu.memory_space<vmem>>, vector<2x128xf32>
    tpu.vector_store %arg12[%c2, %c0_25], %58 {strides = array<i32>} : memref<16x128xf32, #tpu.memory_space<vmem>>, vector<2x128xf32>,
    %60 = vector.extract_strided_slice %16 {offsets = [4, 0], sizes = [2, 512], strides = [1, 1]} : vector<16x512xf32> to vector<2x512xf32>
    %61 = arith.truncf %58 : vector<2x128xf32> to vector<2x128xbf16>
    %cst_26 = arith.constant dense<0.000000e+00> : vector<2x512xf32>
    %62 = tpu.matmul %61, %17, %cst_26 {dimension_numbers = #tpu.dot_dimension_numbers<[1], [0], [0], [1], [0, 0, 1, 1], [], []>} : vector<2x128xbf16>, vector<128x512xbf16>, vector<2x512xf32> -> vector<2x512xf32>
    %63 = arith.addf %60, %62 : vector<2x512xf32>
    %64 = vector.extract_strided_slice %63 {offsets = [0, 0], sizes = [2, 384], strides = [1, 1]} : vector<2x512xf32> to vector<2x384xf32>
    %65 = arith.negf %64 : vector<2x384xf32>
    %66 = math.exp %65 : vector<2x384xf32>
    %cst_27 = arith.constant 1.000000e+00 : f32
    %67 = vector.broadcast %cst_27 : f32 to vector<2x384xf32>
    %68 = arith.addf %67, %66 : vector<2x384xf32>
    %69 = arith.divf %67, %68 : vector<2x384xf32>
    %70 = vector.extract_strided_slice %69 {offsets = [0, 0], sizes = [2, 128], strides = [1, 1]} : vector<2x384xf32> to vector<2x128xf32>
    %71 = vector.extract_strided_slice %69 {offsets = [0, 128], sizes = [2, 128], strides = [1, 1]} : vector<2x384xf32> to vector<2x128xf32>
    %72 = vector.extract_strided_slice %69 {offsets = [0, 256], sizes = [2, 128], strides = [1, 1]} : vector<2x384xf32> to vector<2x128xf32>
    %73 = vector.extract_strided_slice %63 {offsets = [0, 384], sizes = [2, 128], strides = [1, 1]} : vector<2x512xf32> to vector<2x128xf32>
    %74 = math.tanh %73 : vector<2x128xf32>
    %75 = arith.mulf %71, %56 : vector<2x128xf32>
    %76 = arith.mulf %70, %74 : vector<2x128xf32>
    %77 = arith.addf %75, %76 : vector<2x128xf32>
    %78 = math.tanh %77 : vector<2x128xf32>
    %79 = arith.mulf %72, %78 : vector<2x128xf32>
    %c4 = arith.constant 4 : index
    %c0_28 = arith.constant 0 : index
    %80 = vector.load %arg12[%c4, %c0_28] : memref<16x128xf32, #tpu.memory_space<vmem>>, vector<2x128xf32>
    tpu.vector_store %arg12[%c4, %c0_28], %79 {strides = array<i32>} : memref<16x128xf32, #tpu.memory_space<vmem>>, vector<2x128xf32>,
    %81 = vector.extract_strided_slice %16 {offsets = [6, 0], sizes = [2, 512], strides = [1, 1]} : vector<16x512xf32> to vector<2x512xf32>
    %82 = arith.truncf %79 : vector<2x128xf32> to vector<2x128xbf16>
    %cst_29 = arith.constant dense<0.000000e+00> : vector<2x512xf32>
    %83 = tpu.matmul %82, %17, %cst_29 {dimension_numbers = #tpu.dot_dimension_numbers<[1], [0], [0], [1], [0, 0, 1, 1], [], []>} : vector<2x128xbf16>, vector<128x512xbf16>, vector<2x512xf32> -> vector<2x512xf32>
    %84 = arith.addf %81, %83 : vector<2x512xf32>
    %85 = vector.extract_strided_slice %84 {offsets = [0, 0], sizes = [2, 384], strides = [1, 1]} : vector<2x512xf32> to vector<2x384xf32>
    %86 = arith.negf %85 : vector<2x384xf32>
    %87 = math.exp %86 : vector<2x384xf32>
    %cst_30 = arith.constant 1.000000e+00 : f32
    %88 = vector.broadcast %cst_30 : f32 to vector<2x384xf32>
    %89 = arith.addf %88, %87 : vector<2x384xf32>
    %90 = arith.divf %88, %89 : vector<2x384xf32>
    %91 = vector.extract_strided_slice %90 {offsets = [0, 0], sizes = [2, 128], strides = [1, 1]} : vector<2x384xf32> to vector<2x128xf32>
    %92 = vector.extract_strided_slice %90 {offsets = [0, 128], sizes = [2, 128], strides = [1, 1]} : vector<2x384xf32> to vector<2x128xf32>
    %93 = vector.extract_strided_slice %90 {offsets = [0, 256], sizes = [2, 128], strides = [1, 1]} : vector<2x384xf32> to vector<2x128xf32>
    %94 = vector.extract_strided_slice %84 {offsets = [0, 384], sizes = [2, 128], strides = [1, 1]} : vector<2x512xf32> to vector<2x128xf32>
    %95 = math.tanh %94 : vector<2x128xf32>
    %96 = arith.mulf %92, %77 : vector<2x128xf32>
    %97 = arith.mulf %91, %95 : vector<2x128xf32>
    %98 = arith.addf %96, %97 : vector<2x128xf32>
    %99 = math.tanh %98 : vector<2x128xf32>
    %100 = arith.mulf %93, %99 : vector<2x128xf32>
    %c6 = arith.constant 6 : index
    %c0_31 = arith.constant 0 : index
    %101 = vector.load %arg12[%c6, %c0_31] : memref<16x128xf32, #tpu.memory_space<vmem>>, vector<2x128xf32>
    tpu.vector_store %arg12[%c6, %c0_31], %100 {strides = array<i32>} : memref<16x128xf32, #tpu.memory_space<vmem>>, vector<2x128xf32>,
    %102 = vector.extract_strided_slice %16 {offsets = [8, 0], sizes = [2, 512], strides = [1, 1]} : vector<16x512xf32> to vector<2x512xf32>
    %103 = arith.truncf %100 : vector<2x128xf32> to vector<2x128xbf16>
    %cst_32 = arith.constant dense<0.000000e+00> : vector<2x512xf32>
    %104 = tpu.matmul %103, %17, %cst_32 {dimension_numbers = #tpu.dot_dimension_numbers<[1], [0], [0], [1], [0, 0, 1, 1], [], []>} : vector<2x128xbf16>, vector<128x512xbf16>, vector<2x512xf32> -> vector<2x512xf32>
    %105 = arith.addf %102, %104 : vector<2x512xf32>
    %106 = vector.extract_strided_slice %105 {offsets = [0, 0], sizes = [2, 384], strides = [1, 1]} : vector<2x512xf32> to vector<2x384xf32>
    %107 = arith.negf %106 : vector<2x384xf32>
    %108 = math.exp %107 : vector<2x384xf32>
    %cst_33 = arith.constant 1.000000e+00 : f32
    %109 = vector.broadcast %cst_33 : f32 to vector<2x384xf32>
    %110 = arith.addf %109, %108 : vector<2x384xf32>
    %111 = arith.divf %109, %110 : vector<2x384xf32>
    %112 = vector.extract_strided_slice %111 {offsets = [0, 0], sizes = [2, 128], strides = [1, 1]} : vector<2x384xf32> to vector<2x128xf32>
    %113 = vector.extract_strided_slice %111 {offsets = [0, 128], sizes = [2, 128], strides = [1, 1]} : vector<2x384xf32> to vector<2x128xf32>
    %114 = vector.extract_strided_slice %111 {offsets = [0, 256], sizes = [2, 128], strides = [1, 1]} : vector<2x384xf32> to vector<2x128xf32>
    %115 = vector.extract_strided_slice %105 {offsets = [0, 384], sizes = [2, 128], strides = [1, 1]} : vector<2x512xf32> to vector<2x128xf32>
    %116 = math.tanh %115 : vector<2x128xf32>
    %117 = arith.mulf %113, %98 : vector<2x128xf32>
    %118 = arith.mulf %112, %116 : vector<2x128xf32>
    %119 = arith.addf %117, %118 : vector<2x128xf32>
    %120 = math.tanh %119 : vector<2x128xf32>
    %121 = arith.mulf %114, %120 : vector<2x128xf32>
    %c8 = arith.constant 8 : index
    %c0_34 = arith.constant 0 : index
    %122 = vector.load %arg12[%c8, %c0_34] : memref<16x128xf32, #tpu.memory_space<vmem>>, vector<2x128xf32>
    tpu.vector_store %arg12[%c8, %c0_34], %121 {strides = array<i32>} : memref<16x128xf32, #tpu.memory_space<vmem>>, vector<2x128xf32>,
    %123 = vector.extract_strided_slice %16 {offsets = [10, 0], sizes = [2, 512], strides = [1, 1]} : vector<16x512xf32> to vector<2x512xf32>
    %124 = arith.truncf %121 : vector<2x128xf32> to vector<2x128xbf16>
    %cst_35 = arith.constant dense<0.000000e+00> : vector<2x512xf32>
    %125 = tpu.matmul %124, %17, %cst_35 {dimension_numbers = #tpu.dot_dimension_numbers<[1], [0], [0], [1], [0, 0, 1, 1], [], []>} : vector<2x128xbf16>, vector<128x512xbf16>, vector<2x512xf32> -> vector<2x512xf32>
    %126 = arith.addf %123, %125 : vector<2x512xf32>
    %127 = vector.extract_strided_slice %126 {offsets = [0, 0], sizes = [2, 384], strides = [1, 1]} : vector<2x512xf32> to vector<2x384xf32>
    %128 = arith.negf %127 : vector<2x384xf32>
    %129 = math.exp %128 : vector<2x384xf32>
    %cst_36 = arith.constant 1.000000e+00 : f32
    %130 = vector.broadcast %cst_36 : f32 to vector<2x384xf32>
    %131 = arith.addf %130, %129 : vector<2x384xf32>
    %132 = arith.divf %130, %131 : vector<2x384xf32>
    %133 = vector.extract_strided_slice %132 {offsets = [0, 0], sizes = [2, 128], strides = [1, 1]} : vector<2x384xf32> to vector<2x128xf32>
    %134 = vector.extract_strided_slice %132 {offsets = [0, 128], sizes = [2, 128], strides = [1, 1]} : vector<2x384xf32> to vector<2x128xf32>
    %135 = vector.extract_strided_slice %132 {offsets = [0, 256], sizes = [2, 128], strides = [1, 1]} : vector<2x384xf32> to vector<2x128xf32>
    %136 = vector.extract_strided_slice %126 {offsets = [0, 384], sizes = [2, 128], strides = [1, 1]} : vector<2x512xf32> to vector<2x128xf32>
    %137 = math.tanh %136 : vector<2x128xf32>
    %138 = arith.mulf %134, %119 : vector<2x128xf32>
    %139 = arith.mulf %133, %137 : vector<2x128xf32>
    %140 = arith.addf %138, %139 : vector<2x128xf32>
    %141 = math.tanh %140 : vector<2x128xf32>
    %142 = arith.mulf %135, %141 : vector<2x128xf32>
    %c10 = arith.constant 10 : index
    %c0_37 = arith.constant 0 : index
    %143 = vector.load %arg12[%c10, %c0_37] : memref<16x128xf32, #tpu.memory_space<vmem>>, vector<2x128xf32>
    tpu.vector_store %arg12[%c10, %c0_37], %142 {strides = array<i32>} : memref<16x128xf32, #tpu.memory_space<vmem>>, vector<2x128xf32>,
    %144 = vector.extract_strided_slice %16 {offsets = [12, 0], sizes = [2, 512], strides = [1, 1]} : vector<16x512xf32> to vector<2x512xf32>
    %145 = arith.truncf %142 : vector<2x128xf32> to vector<2x128xbf16>
    %cst_38 = arith.constant dense<0.000000e+00> : vector<2x512xf32>
    %146 = tpu.matmul %145, %17, %cst_38 {dimension_numbers = #tpu.dot_dimension_numbers<[1], [0], [0], [1], [0, 0, 1, 1], [], []>} : vector<2x128xbf16>, vector<128x512xbf16>, vector<2x512xf32> -> vector<2x512xf32>
    %147 = arith.addf %144, %146 : vector<2x512xf32>
    %148 = vector.extract_strided_slice %147 {offsets = [0, 0], sizes = [2, 384], strides = [1, 1]} : vector<2x512xf32> to vector<2x384xf32>
    %149 = arith.negf %148 : vector<2x384xf32>
    %150 = math.exp %149 : vector<2x384xf32>
    %cst_39 = arith.constant 1.000000e+00 : f32
    %151 = vector.broadcast %cst_39 : f32 to vector<2x384xf32>
    %152 = arith.addf %151, %150 : vector<2x384xf32>
    %153 = arith.divf %151, %152 : vector<2x384xf32>
    %154 = vector.extract_strided_slice %153 {offsets = [0, 0], sizes = [2, 128], strides = [1, 1]} : vector<2x384xf32> to vector<2x128xf32>
    %155 = vector.extract_strided_slice %153 {offsets = [0, 128], sizes = [2, 128], strides = [1, 1]} : vector<2x384xf32> to vector<2x128xf32>
    %156 = vector.extract_strided_slice %153 {offsets = [0, 256], sizes = [2, 128], strides = [1, 1]} : vector<2x384xf32> to vector<2x128xf32>
    %157 = vector.extract_strided_slice %147 {offsets = [0, 384], sizes = [2, 128], strides = [1, 1]} : vector<2x512xf32> to vector<2x128xf32>
    %158 = math.tanh %157 : vector<2x128xf32>
    %159 = arith.mulf %155, %140 : vector<2x128xf32>
    %160 = arith.mulf %154, %158 : vector<2x128xf32>
    %161 = arith.addf %159, %160 : vector<2x128xf32>
    %162 = math.tanh %161 : vector<2x128xf32>
    %163 = arith.mulf %156, %162 : vector<2x128xf32>
    %c12 = arith.constant 12 : index
    %c0_40 = arith.constant 0 : index
    %164 = vector.load %arg12[%c12, %c0_40] : memref<16x128xf32, #tpu.memory_space<vmem>>, vector<2x128xf32>
    tpu.vector_store %arg12[%c12, %c0_40], %163 {strides = array<i32>} : memref<16x128xf32, #tpu.memory_space<vmem>>, vector<2x128xf32>,
    %165 = vector.extract_strided_slice %16 {offsets = [14, 0], sizes = [2, 512], strides = [1, 1]} : vector<16x512xf32> to vector<2x512xf32>
    %166 = arith.truncf %163 : vector<2x128xf32> to vector<2x128xbf16>
    %cst_41 = arith.constant dense<0.000000e+00> : vector<2x512xf32>
    %167 = tpu.matmul %166, %17, %cst_41 {dimension_numbers = #tpu.dot_dimension_numbers<[1], [0], [0], [1], [0, 0, 1, 1], [], []>} : vector<2x128xbf16>, vector<128x512xbf16>, vector<2x512xf32> -> vector<2x512xf32>
    %168 = arith.addf %165, %167 : vector<2x512xf32>
    %169 = vector.extract_strided_slice %168 {offsets = [0, 0], sizes = [2, 384], strides = [1, 1]} : vector<2x512xf32> to vector<2x384xf32>
    %170 = arith.negf %169 : vector<2x384xf32>
    %171 = math.exp %170 : vector<2x384xf32>
    %cst_42 = arith.constant 1.000000e+00 : f32
    %172 = vector.broadcast %cst_42 : f32 to vector<2x384xf32>
    %173 = arith.addf %172, %171 : vector<2x384xf32>
    %174 = arith.divf %172, %173 : vector<2x384xf32>
    %175 = vector.extract_strided_slice %174 {offsets = [0, 0], sizes = [2, 128], strides = [1, 1]} : vector<2x384xf32> to vector<2x128xf32>
    %176 = vector.extract_strided_slice %174 {offsets = [0, 128], sizes = [2, 128], strides = [1, 1]} : vector<2x384xf32> to vector<2x128xf32>
    %177 = vector.extract_strided_slice %174 {offsets = [0, 256], sizes = [2, 128], strides = [1, 1]} : vector<2x384xf32> to vector<2x128xf32>
    %178 = vector.extract_strided_slice %168 {offsets = [0, 384], sizes = [2, 128], strides = [1, 1]} : vector<2x512xf32> to vector<2x128xf32>
    %179 = math.tanh %178 : vector<2x128xf32>
    %180 = arith.mulf %176, %161 : vector<2x128xf32>
    %181 = arith.mulf %175, %179 : vector<2x128xf32>
    %182 = arith.addf %180, %181 : vector<2x128xf32>
    %183 = math.tanh %182 : vector<2x128xf32>
    %184 = arith.mulf %177, %183 : vector<2x128xf32>
    %c14 = arith.constant 14 : index
    %c0_43 = arith.constant 0 : index
    %185 = vector.load %arg12[%c14, %c0_43] : memref<16x128xf32, #tpu.memory_space<vmem>>, vector<2x128xf32>
    tpu.vector_store %arg12[%c14, %c0_43], %184 {strides = array<i32>} : memref<16x128xf32, #tpu.memory_space<vmem>>, vector<2x128xf32>,
    %c0_44 = arith.constant 0 : index
    %c0_45 = arith.constant 0 : index
    %186 = vector.load %arg12[%c0_44, %c0_45] : memref<16x128xf32, #tpu.memory_space<vmem>>, vector<16x128xf32>
    %187 = arith.truncf %186 : vector<16x128xf32> to vector<16x128xbf16>
    %c0_46 = arith.constant 0 : index
    %c0_47 = arith.constant 0 : index
    %188 = vector.load %arg9[%c0_46, %c0_47] : memref<128x128xbf16, #tpu.memory_space<vmem>>, vector<128x128xbf16>
    %cst_48 = arith.constant dense<0.000000e+00> : vector<16x128xf32>
    %189 = tpu.matmul %187, %188, %cst_48 {dimension_numbers = #tpu.dot_dimension_numbers<[1], [0], [0], [1], [0, 0, 1, 1], [], []>} : vector<16x128xbf16>, vector<128x128xbf16>, vector<16x128xf32> -> vector<16x128xf32>
    %c0_49 = arith.constant 0 : index
    %c0_50 = arith.constant 0 : index
    %190 = vector.load %arg10[%c0_49, %c0_50] : memref<1x128xf32, #tpu.memory_space<vmem>>, vector<1x128xf32>
    %191 = vector.broadcast %190 : vector<1x128xf32> to vector<16x128xf32>
    %192 = arith.addf %189, %191 : vector<16x128xf32>
    %c0_51 = arith.constant 0 : index
    %c0_52 = arith.constant 0 : index
    %193 = vector.load %arg11[%c0_51, %c0_52] : memref<16x128xf32, #tpu.memory_space<vmem>>, vector<16x128xf32>
    tpu.vector_store %arg11[%c0_51, %c0_52], %192 {strides = array<i32>} : memref<16x128xf32, #tpu.memory_space<vmem>>, vector<16x128xf32>,
    return
  }
}

</mosaic_0001>

<bundles_post_ra>
// kernel: caption_net_forward.1
= control target key start
LH: loop header
LB: loop body
LE: loop exit
PB: predicated region body
PF: predicated region fallthrough
CT: control target
= control target key end

     0   :  { %s3692_s2 = inlined_call_operand.vmem [shape: bf16[256,128], index: 2, kind: input, shape index: {}]   ;;  %s3693_s0 = inlined_call_operand.vmem [shape: bf16[2,256], index: 0, kind: input, shape index: {}]   ;;  %s3694_s4 = inlined_call_operand.vmem [shape: bf16[256,128], index: 4, kind: input, shape index: {}]   ;;  %s3695_s6 = inlined_call_operand.vmem [shape: bf16[128,512], index: 6, kind: input, shape index: {}]   ;;  %s3696_s3 = inlined_call_operand.vmem [shape: f32[1,128], index: 3, kind: input, shape index: {}]   ;;  %s3697_s5 = inlined_call_operand.vmem [shape: f32[1,128], index: 5, kind: input, shape index: {}]   ;;  %s3698_s7 = inlined_call_operand.vmem [shape: bf16[128,512], index: 7, kind: input, shape index: {}]   ;;  %s3699_s1 = inlined_call_operand.vmem [shape: bf16[16,128], index: 1, kind: input, shape index: {}]   ;;  %s3700_s8 = inlined_call_operand.vmem [shape: f32[1,512], index: 8, kind: input, shape index: {}]   ;;  %s3701_s10 = inlined_call_operand.vmem [shape: f32[1,128], index: 10, kind: input, shape index: {}]   ;;  %s3702_s9 = inlined_call_operand.vmem [shape: bf16[128,128], index: 9, kind: input, shape index: {}]   ;;  %s3703_s11 = inlined_call_operand.vmem [shape: f32[16,128], index: 11, kind: output, shape index: {}]  }
   0x1   :  { %v2442_v0 = vld [vmem:[%s3692_s2 + $0x38] sm:$0xff]  ;;  %v2441_v2 = vld [vmem:[%s3692_s2 + $0x30] sm:$0xff]  ;;  %v38_v4 = vld [vmem:[%s3693_s0] sm:$0x3] }
   0x2   :  { %v2450_v1 = vld [vmem:[%s3692_s2 + $0x78] sm:$0xff]  ;;  %177 = vmatpush.bf16.msra.mxu0 %v2442_v0  ;;  %v2449_v3 = vld [vmem:[%s3692_s2 + $0x70] sm:$0xff]  ;;  %v2440_v6 = vld [vmem:[%s3692_s2 + $0x28] sm:$0xff]  ;;  %76 = vst [vmem:[#allocation1] ss:$9 sm:$0xff] %v38_v4 }
   0x3   :  { %190 = vmatpush.bf16.msra.mxu1 %v2450_v1  ;;  %v2458_v5 = vld [vmem:[%s3694_s4 + $0x38] sm:$0xff]  ;;  %v2448_v7 = vld [vmem:[%s3692_s2 + $0x68] sm:$0xff]  ;;  %v2457_v9 = vld [vmem:[%s3694_s4 + $0x30] sm:$0xff] }
   0x4   :  { %v2466_v8 = vld [vmem:[%s3694_s4 + $0x78] sm:$0xff]  ;;  %340 = vmatpush.bf16.msra.mxu2 %v2458_v5  ;;  %v2465_v10 = vld [vmem:[%s3694_s4 + $0x70] sm:$0xff]  ;;  %v2439_v11 = vld [vmem:[%s3692_s2 + $0x20] sm:$0xff] }
   0x5   :  { %353 = vmatpush.bf16.msra.mxu3 %v2466_v8  ;;  %v2447_v12 = vld [vmem:[%s3692_s2 + $0x60] sm:$0xff]  ;;  %v2456_v13 = vld [vmem:[%s3694_s4 + $0x28] sm:$0xff]  ;;  %v2438_v17 = vld [vmem:[%s3692_s2 + $0x18] sm:$0xff] }
   0x6   :  { %178 = vmatpush.bf16.msra.mxu0 %v2441_v2  ;;  %v2464_v14 = vld [vmem:[%s3694_s4 + $0x68] sm:$0xff]  ;;  %v2446_v18 = vld [vmem:[%s3692_s2 + $0x58] sm:$0xff]  ;;  %v2455_v19 = vld [vmem:[%s3694_s4 + $0x20] sm:$0xff] }
   0x7   :  { %191 = vmatpush.bf16.msra.mxu1 %v2449_v3  ;;  %v2463_v20 = vld [vmem:[%s3694_s4 + $0x60] sm:$0xff]  ;;  %v2437_v21 = vld [vmem:[%s3692_s2 + $0x10] sm:$0xff]  ;;  %v2454_v23 = vld [vmem:[%s3694_s4 + $0x18] sm:$0xff] }
   0x8   :  { %341 = vmatpush.bf16.msra.mxu2 %v2457_v9  ;;  %v2445_v22 = vld [vmem:[%s3692_s2 + $0x50] sm:$0xff]  ;;  %v2462_v24 = vld [vmem:[%s3694_s4 + $0x58] sm:$0xff]  ;;  %v2436_v25 = vld [vmem:[%s3692_s2 + $0x8] sm:$0xff] }
   0x9   :  { %354 = vmatpush.bf16.msra.mxu3 %v2465_v10  ;;  %v77_v15 = vld [vmem:[#allocation1] sm:$0xff]  ;;  %v78_v16 = vld [vmem:[#allocation1 + $0x9] sm:$0xff]  ;;  %v2239_v32 = vld [vmem:[%s3695_s6 + $0xf0] sm:$0xf0] }
   0xa   :  { %179 = vmatpush.bf16.msra.mxu0 %v2440_v6  ;;  %239 = vst [vmem:[#allocation1] ss:$9 sm:$0xff] %v38_v4  ;;  %v2444_v26 = vld [vmem:[%s3692_s2 + $0x48] sm:$0xff]  ;;  %v2453_v27 = vld [vmem:[%s3694_s4 + $0x10] sm:$0xff]  ;;  %v2237_v29 = vld [vmem:[%s3695_s6 + $0xe0] sm:$0xf] }
   0xb   :  { %192 = vmatpush.bf16.msra.mxu1 %v2448_v7  ;;  %v2461_v28 = vld [vmem:[%s3694_s4 + $0x50] sm:$0xff]  ;;  %v2496_v31 = vld [vmem:[%s3695_s6 + $0xe4] sm:$0xf]  ;;  %v2452_v35 = vld [vmem:[%s3694_s4 + $0x8] sm:$0xff] }
   0xc   :  { %342 = vmatpush.bf16.msra.mxu2 %v2456_v13  ;;  %v2498_v30 = vld [vmem:[%s3695_s6 + $0xec] sm:$0xf0]  ;;  %v2435_v33 = vld [vmem:[%s3692_s2] sm:$0xff]  ;;  %v2460_v37 = vld [vmem:[%s3694_s4 + $0x48] sm:$0xff]  ;;  %v2242_v38 = vor.u32 %v2496_v31, %v2239_v32 }
   0xd   :  { %355 = vmatpush.bf16.msra.mxu3 %v2464_v14  ;;  %v2443_v34 = vld [vmem:[%s3692_s2 + $0x40] sm:$0xff]  ;;  %v2238_v36 = vor.u32 %v2498_v30, %v2237_v29  ;;  %v2494_v40 = vld [vmem:[%s3695_s6 + $0xcc] sm:$0xf0]  ;;  %v2245_v41 = vld [vmem:[%s3695_s6 + $0xe8] sm:$0xf] }
   0xe   :  { %180 = vmatpush.bf16.msra.mxu0 %v2439_v11  ;;  %v2221_v39 = vld [vmem:[%s3695_s6 + $0xc0] sm:$0xf]  ;;  %v2499_v42 = vld [vmem:[%s3695_s6 + $0xf4] sm:$0xf0]  ;;  %v2497_v43 = vld [vmem:[%s3695_s6 + $0xec] sm:$0xf] }
   0xf   :  { %193 = vmatpush.bf16.msra.mxu1 %v2447_v12  ;;  %v2247_v44 = vld [vmem:[%s3695_s6 + $0xf8] sm:$0xf0]  ;;  %v2492_v45 = vld [vmem:[%s3695_s6 + $0xc4] sm:$0xf]  ;;  %v2223_v46 = vld [vmem:[%s3695_s6 + $0xd0] sm:$0xf0]  ;;  %v2222_v48 = vor.u32 %v2494_v40, %v2221_v39  ;;  %v2246_v50 = vor.u32 %v2499_v42, %v2245_v41 }
  0x10   :  { %343 = vmatpush.bf16.msra.mxu2 %v2455_v19  ;;  %v2451_v47 = vld [vmem:[%s3694_s4] sm:$0xff]  ;;  %v2490_v52 = vld [vmem:[%s3695_s6 + $0xac] sm:$0xf0]  ;;  %v2250_v53 = vor.u32 %v2497_v43, %v2247_v44  ;;  %v2226_v54 = vor.u32 %v2492_v45, %v2223_v46  ;;  %v2229_v55 = vld [vmem:[%s3695_s6 + $0xc8] sm:$0xf] }
  0x11   :  { %356 = vmatpush.bf16.msra.mxu3 %v2463_v20  ;;  %v2459_v49 = vld [vmem:[%s3694_s4 + $0x40] sm:$0xff]  ;;  %v2495_v56 = vld [vmem:[%s3695_s6 + $0xd4] sm:$0xf0]  ;;  %v2493_v57 = vld [vmem:[%s3695_s6 + $0xcc] sm:$0xf] }
  0x12   :  { %181 = vmatpush.bf16.msra.mxu0 %v2438_v17  ;;  %v2205_v51 = vld [vmem:[%s3695_s6 + $0xa0] sm:$0xf]  ;;  %v2231_v58 = vld [vmem:[%s3695_s6 + $0xd8] sm:$0xf0]  ;;  %v2488_v59 = vld [vmem:[%s3695_s6 + $0xa4] sm:$0xf]  ;;  %v2230_v63 = vor.u32 %v2495_v56, %v2229_v55 }
  0x13   :  { %194 = vmatpush.bf16.msra.mxu1 %v2446_v18  ;;  %v2207_v60 = vld [vmem:[%s3695_s6 + $0xb0] sm:$0xf0]  ;;  %v2206_v61 = vor.u32 %v2490_v52, %v2205_v51  ;;  %v240_v62 = vld [vmem:[#allocation1] sm:$0xff]  ;;  %v2486_v1 = vld [vmem:[%s3695_s6 + $0x8c] sm:$0xf0]  ;;  %v2234_v3 = vor.u32 %v2493_v57, %v2231_v58 }
  0x14   :  { %344 = vmatpush.bf16.msra.mxu2 %v2454_v23  ;;  %v2189_v0 = vld [vmem:[%s3695_s6 + $0x80] sm:$0xf]  ;;  %v241_v2 = vld [vmem:[#allocation1 + $0x9] sm:$0xff]  ;;  %v2210_v4 = vor.u32 %v2488_v59, %v2207_v60  ;;  %v2491_v6 = vld [vmem:[%s3695_s6 + $0xb4] sm:$0xf0] }
  0x15   :  { %357 = vmatpush.bf16.msra.mxu3 %v2462_v24  ;;  %v2213_v5 = vld [vmem:[%s3695_s6 + $0xa8] sm:$0xf]  ;;  %v2489_v7 = vld [vmem:[%s3695_s6 + $0xac] sm:$0xf]  ;;  %v2215_v8 = vld [vmem:[%s3695_s6 + $0xb8] sm:$0xf0]  ;;  %v2190_v11 = vor.u32 %v2486_v1, %v2189_v0 }
  0x16   :  { %182 = vmatpush.bf16.msra.mxu0 %v2437_v21  ;;  %v2484_v9 = vld [vmem:[%s3695_s6 + $0x84] sm:$0xf]  ;;  %v2191_v10 = vld [vmem:[%s3695_s6 + $0x90] sm:$0xf0]  ;;  %v2214_v12 = vor.u32 %v2491_v6, %v2213_v5  ;;  %v2173_v13 = vld [vmem:[%s3695_s6 + $0x60] sm:$0xf] }
  0x17   :  { %195 = vmatpush.bf16.msra.mxu1 %v2445_v22  ;;  %v2482_v14 = vld [vmem:[%s3695_s6 + $0x6c] sm:$0xf0]  ;;  %v2197_v17 = vld [vmem:[%s3695_s6 + $0x88] sm:$0xf]  ;;  %v2487_v18 = vld [vmem:[%s3695_s6 + $0x94] sm:$0xf0] }
  0x18   :  { %345 = vmatpush.bf16.msra.mxu2 %v2453_v27  ;;  %v2485_v19 = vld [vmem:[%s3695_s6 + $0x8c] sm:$0xf]  ;;  %v2199_v20 = vld [vmem:[%s3695_s6 + $0x98] sm:$0xf0]  ;;  %v2480_v21 = vld [vmem:[%s3695_s6 + $0x64] sm:$0xf]  ;;  %v2174_v23 = vor.u32 %v2482_v14, %v2173_v13 }
  0x19   :  { %358 = vmatpush.bf16.msra.mxu3 %v2461_v28  ;;  %v2175_v22 = vld [vmem:[%s3695_s6 + $0x70] sm:$0xf0]  ;;  %v2157_v24 = vld [vmem:[%s3695_s6 + $0x40] sm:$0xf]  ;;  %v2202_v27 = vor.u32 %v2485_v19, %v2199_v20  ;;  %v2181_v29 = vld [vmem:[%s3695_s6 + $0x68] sm:$0xf] }
  0x1a   :  { %183 = vmatpush.bf16.msra.mxu0 %v2436_v25  ;;  %v2198_v25 = vor.u32 %v2487_v18, %v2197_v17  ;;  %v2178_v28 = vor.u32 %v2480_v21, %v2175_v22  ;;  %v2483_v30 = vld [vmem:[%s3695_s6 + $0x74] sm:$0xf0]  ;;  %v2481_v31 = vld [vmem:[%s3695_s6 + $0x6c] sm:$0xf]  ;;  %v2183_v32 = vld [vmem:[%s3695_s6 + $0x78] sm:$0xf0] }
  0x1b   :  { %196 = vmatpush.bf16.msra.mxu1 %v2444_v26  ;;  %v2478_v26 = vld [vmem:[%s3695_s6 + $0x4c] sm:$0xf0]  ;;  %v2186_v39 = vor.u32 %v2481_v31, %v2183_v32  ;;  %v2165_v41 = vld [vmem:[%s3695_s6 + $0x48] sm:$0xf]  ;;  %v2479_v42 = vld [vmem:[%s3695_s6 + $0x54] sm:$0xf0] }
  0x1c   :  { %346 = vmatpush.bf16.msra.mxu2 %v2452_v35  ;;  %v2158_v35 = vor.u32 %v2478_v26, %v2157_v24  ;;  %v2477_v43 = vld [vmem:[%s3695_s6 + $0x4c] sm:$0xf]  ;;  %v2167_v44 = vld [vmem:[%s3695_s6 + $0x58] sm:$0xf0]  ;;  %v2472_v45 = vld [vmem:[%s3695_s6 + $0x24] sm:$0xf] }
  0x1d   :  { %359 = vmatpush.bf16.msra.mxu3 %v2460_v37  ;;  %v2141_v37 = vld [vmem:[%s3695_s6 + $0x20] sm:$0xf]  ;;  %v2143_v46 = vld [vmem:[%s3695_s6 + $0x30] sm:$0xf0]  ;;  %v2470_v52 = vld [vmem:[%s3695_s6 + $0xc] sm:$0xf0] }
  0x1e   :  { %184 = vmatpush.bf16.msra.mxu0 %v2435_v33  ;;  %v2476_v33 = vld [vmem:[%s3695_s6 + $0x44] sm:$0xf]  ;;  %v2125_v51 = vld [vmem:[%s3695_s6] sm:$0xf]  ;;  %v2473_v55 = vld [vmem:[%s3695_s6 + $0x2c] sm:$0xf] }
  0x1f   :  { %197 = vmatpush.bf16.msra.mxu1 %v2443_v34  ;;  %v2159_v34 = vld [vmem:[%s3695_s6 + $0x50] sm:$0xf0]  ;;  %v2365_v56 = vld [vmem:[%s3698_s7 + $0xe0] sm:$0xf]  ;;  %v2530_v57 = vld [vmem:[%s3698_s7 + $0xec] sm:$0xf0] }
  0x20   :  { %347 = vmatpush.bf16.msra.mxu2 %v2451_v47  ;;  %v2162_v40 = vor.u32 %v2476_v33, %v2159_v34  ;;  %v2151_v58 = vld [vmem:[%s3695_s6 + $0x38] sm:$0xf0]  ;;  %v2468_v59 = vld [vmem:[%s3695_s6 + $0x4] sm:$0xf]  ;;  %v2127_v60 = vld [vmem:[%s3695_s6 + $0x10] sm:$0xf0]  ;;  %v3034_v5 = vor.u32 %v2530_v57, %v2365_v56 }
  0x21   :  { %185 = vmatmul.bf16.vlgmr.msra.gmra.mxu0 %v77_v15  ;;  %360 = vmatpush.bf16.msra.mxu3 %v2459_v49  ;;  %v2218_v15 = vor.u32 %v2489_v7, %v2215_v8  ;;  %v2166_v49 = vor.u32 %v2479_v42, %v2165_v41  ;;  %v2367_v0 = vld [vmem:[%s3698_s7 + $0xf0] sm:$0xf0]  ;;  %v2154_v6 = vor.u32 %v2473_v55, %v2151_v58  ;;  %v2373_v8 = vld [vmem:[%s3698_s7 + $0xe8] sm:$0xf]  ;;  %v2529_v13 = vld [vmem:[%s3698_s7 + $0xec] sm:$0xf] }
  0x22   :  { %576 = vmatpush.bf16.msrb.mxu0 %v2238_v36  ;;  %198 = vmatmul.bf16.vlgmr.msra.gmra.mxu1 %v78_v16  ;;  %v2194_v16 = vor.u32 %v2484_v9, %v2191_v10  ;;  %v2182_v36 = vor.u32 %v2483_v30, %v2181_v29  ;;  %v2130_v7 = vor.u32 %v2468_v59, %v2127_v60  ;;  %v2349_v9 = vld [vmem:[%s3698_s7 + $0xc0] sm:$0xf]  ;;  %v2526_v10 = vld [vmem:[%s3698_s7 + $0xcc] sm:$0xf0]  ;;  %v2351_v17 = vld [vmem:[%s3698_s7 + $0xd0] sm:$0xf0] }
  0x23   :  { %590 = vmatpush.bf16.msrb.mxu1 %v2242_v38  ;;  %348 = vmatmul.bf16.vlgmr.msra.gmra.mxu2 %v240_v62  ;;  %v2474_v38 = vld [vmem:[%s3695_s6 + $0x2c] sm:$0xf0]  ;;  %v2133_v62 = vld [vmem:[%s3695_s6 + $0x8] sm:$0xf]  ;;  %v2467_v14 = vld [vmem:[%s3699_s1] sm:$0xff]  ;;  %v3066_v19 = vor.u32 %v2526_v10, %v2349_v9 }
  0x24   :  { %604 = vmatpush.bf16.msrb.mxu2 %v2246_v50  ;;  %361 = vmatmul.bf16.vlgmr.msra.gmra.mxu3 %v241_v2  ;;  %v2142_v47 = vor.u32 %v2474_v38, %v2141_v37  ;;  %v2475_v50 = vld [vmem:[%s3695_s6 + $0x34] sm:$0xf0]  ;;  %v2333_v22 = vld [vmem:[%s3698_s7 + $0xa0] sm:$0xf]  ;;  %v2357_v26 = vld [vmem:[%s3698_s7 + $0xc8] sm:$0xf] }
  0x25   :  { %618 = vmatpush.bf16.msrb.mxu3 %v2250_v53  ;;  %v2170_v53 = vor.u32 %v2477_v43, %v2167_v44  ;;  %v2471_v2 = vld [vmem:[%s3695_s6 + $0x14] sm:$0xf0]  ;;  %v2359_v29 = vld [vmem:[%s3698_s7 + $0xd8] sm:$0xf0]  ;;  %v2520_v30 = vld [vmem:[%s3698_s7 + $0xa4] sm:$0xf] }
  0x26   :  { %577 = vmatpush.bf16.msrb.mxu0 %v2222_v48  ;;  %v2149_v48 = vld [vmem:[%s3695_s6 + $0x28] sm:$0xf]  ;;  %v2134_v18 = vor.u32 %v2471_v2, %v2133_v62  ;;  %v2335_v31 = vld [vmem:[%s3698_s7 + $0xb0] sm:$0xf0]  ;;  %v2317_v34 = vld [vmem:[%s3698_s7 + $0x80] sm:$0xf] }
  0x27   :  { %591 = vmatpush.bf16.msrb.mxu1 %v2226_v54  ;;  %v2146_v54 = vor.u32 %v2472_v45, %v2143_v46  ;;  %v2150_v1 = vor.u32 %v2475_v50, %v2149_v48  ;;  %v3115_v37 = vor.u32 %v2520_v30, %v2335_v31  ;;  %v2341_v38 = vld [vmem:[%s3698_s7 + $0xa8] sm:$0xf]  ;;  %v2343_v41 = vld [vmem:[%s3698_s7 + $0xb8] sm:$0xf0]  ;;  %v2516_v42 = vld [vmem:[%s3698_s7 + $0x84] sm:$0xf] }
  0x28   :  { %605 = vmatpush.bf16.msrb.mxu2 %v2230_v63  ;;  %v2528_v63 = vld [vmem:[%s3698_s7 + $0xe4] sm:$0xf]  ;;  %v2319_v43 = vld [vmem:[%s3698_s7 + $0x90] sm:$0xf0]  ;;  %v2301_v46 = vld [vmem:[%s3698_s7 + $0x60] sm:$0xf] }
  0x29   :  { %619 = vmatpush.bf16.msrb.mxu3 %v2234_v3  ;;  %v2469_v3 = vld [vmem:[%s3695_s6 + $0xc] sm:$0xf]  ;;  %v2325_v50 = vld [vmem:[%s3698_s7 + $0x88] sm:$0xf]  ;;  %v2303_v55 = vld [vmem:[%s3698_s7 + $0x70] sm:$0xf0] }
  0x2a   :  { %578 = vmatpush.bf16.msrb.mxu0 %v2206_v61  ;;  %v2126_v61 = vor.u32 %v2470_v52, %v2125_v51  ;;  %v2519_v51 = vld [vmem:[%s3698_s7 + $0x94] sm:$0xf0]  ;;  %v2517_v52 = vld [vmem:[%s3698_s7 + $0x8c] sm:$0xf]  ;;  %v2285_v58 = vld [vmem:[%s3698_s7 + $0x40] sm:$0xf] }
  0x2b   :  { %592 = vmatpush.bf16.msrb.mxu1 %v2210_v4  ;;  %v2135_v4 = vld [vmem:[%s3695_s6 + $0x18] sm:$0xf0]  ;;  %v3175_v57 = vor.u32 %v2519_v51, %v2325_v50  ;;  %v2510_v59 = vld [vmem:[%s3698_s7 + $0x4c] sm:$0xf0]  ;;  %v2309_v62 = vld [vmem:[%s3698_s7 + $0x68] sm:$0xf] }
  0x2c   :  { %606 = vmatpush.bf16.msrb.mxu2 %v2214_v12  ;;  %v2531_v12 = vld [vmem:[%s3698_s7 + $0xf4] sm:$0xf0]  ;;  %v2138_v20 = vor.u32 %v2469_v3, %v2135_v4  ;;  %v2508_v2 = vld [vmem:[%s3698_s7 + $0x44] sm:$0xf]  ;;  %v2287_v3 = vld [vmem:[%s3698_s7 + $0x50] sm:$0xf0]  ;;  %v3208_v4 = vor.u32 %v2510_v59, %v2285_v58 }
  0x2d   :  { %620 = vmatpush.bf16.msrb.mxu3 %v2218_v15  ;;  %v2375_v15 = vld [vmem:[%s3698_s7 + $0xf8] sm:$0xf0]  ;;  %v3068_v21 = vor.u32 %v2531_v12, %v2373_v8  ;;  %v3217_v8 = vor.u32 %v2508_v2, %v2287_v3  ;;  %v2293_v9 = vld [vmem:[%s3698_s7 + $0x48] sm:$0xf]  ;;  %v2511_v10 = vld [vmem:[%s3698_s7 + $0x54] sm:$0xf0] }
  0x2e   :  { %579 = vmatpush.bf16.msrb.mxu0 %v2190_v11  ;;  %v3045_v11 = vor.u32 %v2528_v63, %v2367_v0  ;;  %v3077_v24 = vor.u32 %v2529_v13, %v2375_v15  ;;  %v2515_v63 = vld [vmem:[%s3698_s7 + $0x74] sm:$0xf0]  ;;  %v2513_v0 = vld [vmem:[%s3698_s7 + $0x6c] sm:$0xf]  ;;  %v2295_v13 = vld [vmem:[%s3698_s7 + $0x58] sm:$0xf0] }
  0x2f   :  { %593 = vmatpush.bf16.msrb.mxu1 %v2194_v16  ;;  %v2524_v16 = vld [vmem:[%s3698_s7 + $0xc4] sm:$0xf]  ;;  %v2509_v12 = vld [vmem:[%s3698_s7 + $0x4c] sm:$0xf]  ;;  %v2279_v30 = vld [vmem:[%s3698_s7 + $0x38] sm:$0xf0] }
  0x30   :  { %607 = vmatpush.bf16.msrb.mxu2 %v2198_v25  ;;  %v3079_v25 = vor.u32 %v2524_v16, %v2351_v17  ;;  %v3237_v15 = vor.u32 %v2509_v12, %v2295_v13  ;;  %v2269_v16 = vld [vmem:[%s3698_s7 + $0x20] sm:$0xf]  ;;  %v2506_v17 = vld [vmem:[%s3698_s7 + $0x2c] sm:$0xf0]  ;;  %v2263_v50 = vld [vmem:[%s3698_s7 + $0x18] sm:$0xf0] }
  0x31   :  { %621 = vmatpush.bf16.msrb.mxu3 %v2202_v27  ;;  %v2527_v27 = vld [vmem:[%s3698_s7 + $0xd4] sm:$0xf0] }
  0x32   :  { %580 = vmatpush.bf16.msrb.mxu0 %v2174_v23  ;;  %v2522_v23 = vld [vmem:[%s3698_s7 + $0xac] sm:$0xf0]  ;;  %v3103_v33 = vor.u32 %v2527_v27, %v2357_v26  ;;  %v2507_v26 = vld [vmem:[%s3698_s7 + $0x34] sm:$0xf0] }
  0x33   :  { %594 = vmatpush.bf16.msrb.mxu1 %v2178_v28  ;;  %v2525_v28 = vld [vmem:[%s3698_s7 + $0xcc] sm:$0xf]  ;;  %v3100_v32 = vor.u32 %v2522_v23, %v2333_v22  ;;  %v2271_v22 = vld [vmem:[%s3698_s7 + $0x30] sm:$0xf0]  ;;  %v2277_v23 = vld [vmem:[%s3698_s7 + $0x28] sm:$0xf] }
  0x34   :  { %608 = vmatpush.bf16.msrb.mxu2 %v2182_v36  ;;  %v3113_v36 = vor.u32 %v2525_v28, %v2359_v29  ;;  %v3263_v28 = vor.u32 %v2507_v26, %v2277_v23  ;;  %v2505_v29 = vld [vmem:[%s3698_s7 + $0x2c] sm:$0xf] }
  0x35   :  { %622 = vmatpush.bf16.msrb.mxu3 %v2186_v39  ;;  %v2523_v39 = vld [vmem:[%s3698_s7 + $0xb4] sm:$0xf0]  ;;  %v3272_v31 = vor.u32 %v2505_v29, %v2279_v30 }
  0x36   :  { %581 = vmatpush.bf16.msrb.mxu0 %v2158_v35  ;;  %v2518_v35 = vld [vmem:[%s3698_s7 + $0x8c] sm:$0xf0]  ;;  %v3139_v45 = vor.u32 %v2523_v39, %v2341_v38  ;;  %v2500_v38 = vld [vmem:[%s3698_s7 + $0x4] sm:$0xf] }
  0x37   :  { %595 = vmatpush.bf16.msrb.mxu1 %v2162_v40  ;;  %v2521_v40 = vld [vmem:[%s3698_s7 + $0xac] sm:$0xf]  ;;  %v3136_v44 = vor.u32 %v2518_v35, %v2317_v34  ;;  %v2253_v34 = vld [vmem:[%s3698_s7] sm:$0xf]  ;;  %v2502_v35 = vld [vmem:[%s3698_s7 + $0xc] sm:$0xf0] }
  0x38   :  { %609 = vmatpush.bf16.msrb.mxu2 %v2166_v49  ;;  %v3149_v48 = vor.u32 %v2521_v40, %v2343_v41  ;;  %v3151_v49 = vor.u32 %v2516_v42, %v2319_v43  ;;  %v3286_v39 = vor.u32 %v2502_v35, %v2253_v34  ;;  %v2255_v40 = vld [vmem:[%s3698_s7 + $0x10] sm:$0xf0]  ;;  %v2261_v41 = vld [vmem:[%s3698_s7 + $0x8] sm:$0xf]  ;;  %v2503_v42 = vld [vmem:[%s3698_s7 + $0x14] sm:$0xf0] }
  0x39   :  { %623 = vmatpush.bf16.msrb.mxu3 %v2170_v53  ;;  %v2327_v53 = vld [vmem:[%s3698_s7 + $0x98] sm:$0xf0]  ;;  %v3297_v43 = vor.u32 %v2500_v38, %v2255_v40 }
  0x3a   :  { %582 = vmatpush.bf16.msrb.mxu0 %v2142_v47  ;;  %v2514_v47 = vld [vmem:[%s3698_s7 + $0x6c] sm:$0xf0]  ;;  %v3185_v60 = vor.u32 %v2517_v52, %v2327_v53  ;;  %v2540_v52 = vld [vmem:[%s3696_s3] ss:$0 sm:$0xff] }
  0x3b   :  { %596 = vmatpush.bf16.msrb.mxu1 %v2146_v54  ;;  %v2512_v54 = vld [vmem:[%s3698_s7 + $0x64] sm:$0xf]  ;;  %v3172_v56 = vor.u32 %v2514_v47, %v2301_v46  ;;  %v3299_v46 = vor.u32 %v2503_v42, %v2261_v41  ;;  %v2501_v47 = vld [vmem:[%s3698_s7 + $0xc] sm:$0xf] }
  0x3c   :  { %610 = vmatpush.bf16.msrb.mxu2 %v2150_v1  ;;  %v2311_v1 = vld [vmem:[%s3698_s7 + $0x78] sm:$0xf0]  ;;  %v3308_v51 = vor.u32 %v2501_v47, %v2263_v50 }
  0x3d   :  { %624 = vmatpush.bf16.msrb.mxu3 %v2154_v6  ;;  %v3211_v6 = vor.u32 %v2515_v63, %v2309_v62 }
  0x3e   :  { %583 = vmatpush.bf16.msrb.mxu0 %v2126_v61  ;;  %v3187_v61 = vor.u32 %v2512_v54, %v2303_v55 }
  0x3f   :  { %597 = vmatpush.bf16.msrb.mxu1 %v2130_v7  ;;  %v3215_v7 = vor.u32 %v2513_v0, %v2311_v1  ;;  %v2541_v0 = vld [vmem:[%s3697_s5] ss:$0 sm:$0xff] }
  0x40   :  { %611 = vmatpush.bf16.msrb.mxu2 %v2134_v18  ;;  %v2504_v18 = vld [vmem:[%s3698_s7 + $0x24] sm:$0xf] }
  0x41   :  { %584 = vmatmul.bf16.vlgmr.msrb.gmra.mxu0 %v2467_v14  ;;  %625 = vmatpush.bf16.msrb.mxu3 %v2138_v20  ;;  %v3250_v20 = vor.u32 %v2506_v17, %v2269_v16  ;;  %v3261_v27 = vor.u32 %v2504_v18, %v2271_v22  ;;  %v3388_v22 = vld [vmem:[%s3700_s8] sm:$0xf] }
  0x42   :  { %825 = vmatpush.bf16.msra.mxu0 %v3034_v5  ;;  %598 = vmatmul.bf16.vlgmr.msrb.gmra.mxu1 %v2467_v14  ;;  %v3707_v29 = vperm.slane %v3388_v22, 0  ;;  %v3706_v30 = vperm.slane %v3388_v22, 1 }
  0x43   :  { %838 = vmatpush.bf16.msra.mxu1 %v3045_v11  ;;  %612 = vmatmul.bf16.vlgmr.msrb.gmra.mxu2 %v2467_v14 }
  0x44   :  { %851 = vmatpush.bf16.msra.mxu2 %v3068_v21  ;;  %626 = vmatmul.bf16.vlgmr.msrb.gmra.mxu3 %v2467_v14  ;;  %v3233_v14 = vor.u32 %v2511_v10, %v2293_v9 }
  0x45   :  { %864 = vmatpush.bf16.msra.mxu3 %v3077_v24 }
  0x46   :  { %826 = vmatpush.bf16.msra.mxu0 %v3066_v19 }
  0x47   :  { %839 = vmatpush.bf16.msra.mxu1 %v3079_v25 }
  0x48   :  { %852 = vmatpush.bf16.msra.mxu2 %v3103_v33 }
  0x49   :  { %865 = vmatpush.bf16.msra.mxu3 %v3113_v36 }
  0x4a   :  { %827 = vmatpush.bf16.msra.mxu0 %v3100_v32 }
  0x4b   :  { %840 = vmatpush.bf16.msra.mxu1 %v3115_v37 }
  0x4c   :  { %853 = vmatpush.bf16.msra.mxu2 %v3139_v45 }
  0x4d   :  { %866 = vmatpush.bf16.msra.mxu3 %v3149_v48 }
  0x4e   :  { %828 = vmatpush.bf16.msra.mxu0 %v3136_v44 }
  0x4f   :  { %841 = vmatpush.bf16.msra.mxu1 %v3151_v49 }
  0x50   :  { %854 = vmatpush.bf16.msra.mxu2 %v3175_v57 }
  0x51   :  { %867 = vmatpush.bf16.msra.mxu3 %v3185_v60 }
  0x52   :  { %829 = vmatpush.bf16.msra.mxu0 %v3172_v56 }
  0x53   :  { %842 = vmatpush.bf16.msra.mxu1 %v3187_v61 }
  0x54   :  { %855 = vmatpush.bf16.msra.mxu2 %v3211_v6 }
  0x55   :  { %868 = vmatpush.bf16.msra.mxu3 %v3215_v7 }
  0x56   :  { %830 = vmatpush.bf16.msra.mxu0 %v3208_v4 }
  0x57   :  { %843 = vmatpush.bf16.msra.mxu1 %v3217_v8 }
  0x58   :  { %856 = vmatpush.bf16.msra.mxu2 %v3233_v14 }
  0x59   :  { %869 = vmatpush.bf16.msra.mxu3 %v3237_v15 }
  0x5a   :  { %831 = vmatpush.bf16.msra.mxu0 %v3250_v20 }
  0x5b   :  { %844 = vmatpush.bf16.msra.mxu1 %v3261_v27 }
  0x5c   :  { %857 = vmatpush.bf16.msra.mxu2 %v3263_v28 }
  0x5d   :  { %870 = vmatpush.bf16.msra.mxu3 %v3272_v31 }
  0x5e   :  { %832 = vmatpush.bf16.msra.mxu0 %v3286_v39 }
  0x5f   :  { %845 = vmatpush.bf16.msra.mxu1 %v3297_v43 }
  0x60   :  { %858 = vmatpush.bf16.msra.mxu2 %v3299_v46 }
  0x61   :  { %871 = vmatpush.bf16.msra.mxu3 %v3308_v51 }
  0x62   :  { %946 = vmatpush.bf16.msrb.mxu0 %v3034_v5 }
  0x63   :  { %959 = vmatpush.bf16.msrb.mxu1 %v3045_v11 }
  0x64   :  { %972 = vmatpush.bf16.msrb.mxu2 %v3068_v21 }
  0x65   :  { %985 = vmatpush.bf16.msrb.mxu3 %v3077_v24 }
  0x66   :  { %947 = vmatpush.bf16.msrb.mxu0 %v3066_v19 }
  0x67   :  { %960 = vmatpush.bf16.msrb.mxu1 %v3079_v25 }
  0x68   :  { %973 = vmatpush.bf16.msrb.mxu2 %v3103_v33 }
  0x69   :  { %986 = vmatpush.bf16.msrb.mxu3 %v3113_v36 }
  0x6a   :  { %948 = vmatpush.bf16.msrb.mxu0 %v3100_v32 }
  0x6b   :  { %961 = vmatpush.bf16.msrb.mxu1 %v3115_v37 }
  0x6c   :  { %974 = vmatpush.bf16.msrb.mxu2 %v3139_v45 }
  0x6d   :  { %987 = vmatpush.bf16.msrb.mxu3 %v3149_v48 }
  0x6e   :  { %949 = vmatpush.bf16.msrb.mxu0 %v3136_v44 }
  0x6f   :  { %962 = vmatpush.bf16.msrb.mxu1 %v3151_v49 }
  0x70   :  { %975 = vmatpush.bf16.msrb.mxu2 %v3175_v57 }
  0x71   :  { %988 = vmatpush.bf16.msrb.mxu3 %v3185_v60 }
  0x72   :  { %950 = vmatpush.bf16.msrb.mxu0 %v3172_v56 }
  0x73   :  { %963 = vmatpush.bf16.msrb.mxu1 %v3187_v61 }
  0x74   :  { %976 = vmatpush.bf16.msrb.mxu2 %v3211_v6 }
  0x75   :  { %989 = vmatpush.bf16.msrb.mxu3 %v3215_v7 }
  0x76   :  { %951 = vmatpush.bf16.msrb.mxu0 %v3208_v4 }
  0x77   :  { %964 = vmatpush.bf16.msrb.mxu1 %v3217_v8 }
  0x78   :  { %977 = vmatpush.bf16.msrb.mxu2 %v3233_v14 }
  0x79   :  { %990 = vmatpush.bf16.msrb.mxu3 %v3237_v15 }
  0x7a   :  { %952 = vmatpush.bf16.msrb.mxu0 %v3250_v20 }
  0x7b   :  { %965 = vmatpush.bf16.msrb.mxu1 %v3261_v27 }
  0x7c   :  { %978 = vmatpush.bf16.msrb.mxu2 %v3263_v28 }
  0x7d   :  { %991 = vmatpush.bf16.msrb.mxu3 %v3272_v31 }
  0x7e   :  { %953 = vmatpush.bf16.msrb.mxu0 %v3286_v39 }
  0x7f   :  { %966 = vmatpush.bf16.msrb.mxu1 %v3297_v43 }
  0x80   :  { %979 = vmatpush.bf16.msrb.mxu2 %v3299_v46 }
  0x81   :  { %992 = vmatpush.bf16.msrb.mxu3 %v3308_v51 }
  0x9e   :  { %v186_v53 = vpop.f32.mrf.mxu0 }
  0x9f   :  { %v199_v54 = vpop.f32.mrf.mxu1  ;;  %v187_v55 = vadd.f32 %v2540_v52, %v186_v53  ;;  %v3705_v52 = vperm.slane %v3388_v22, 2 }
  0xa1   :  { %v200_v58 = vadd.f32 %v199_v54, %v187_v55 }
  0xa3   :  { %v664_v59 = vpack.c.bf16 %v200_v58, %v200_v58 }
  0xa5   :  { %833 = vmatmul.bf16.vlgmr.msra.gmra.mxu0 %v664_v59  ;;  %846 = vmatmul.bf16.vlgmr.msra.gmra.mxu1 %v664_v59 }
  0xa6   :  { %859 = vmatmul.bf16.vlgmr.msra.gmra.mxu2 %v664_v59  ;;  %872 = vmatmul.bf16.vlgmr.msra.gmra.mxu3 %v664_v59  ;;  %v188_v62 = vpop.f32.mrf.mxu0  ;;  %v349_v1 = vpop.f32.mrf.mxu2 }
  0xa7   :  { %v201_v63 = vpop.f32.mrf.mxu1  ;;  %1085 = vmatpush.bf16.msra.mxu0 %v3034_v5  ;;  %1098 = vmatpush.bf16.msra.mxu1 %v3045_v11  ;;  %v350_v2 = vadd.f32 %v2541_v0, %v349_v1  ;;  %v362_v3 = vpop.f32.mrf.mxu3 }
  0xa8   :  { %1111 = vmatpush.bf16.msra.mxu2 %v3068_v21  ;;  %1124 = vmatpush.bf16.msra.mxu3 %v3077_v24 }
  0xa9   :  { %v3357_v9 = vadd.f32 %v362_v3, %v350_v2 }
  0xab   :  { %1086 = vmatpush.bf16.msra.mxu0 %v3066_v19  ;;  %1099 = vmatpush.bf16.msra.mxu1 %v3079_v25 }
  0xac   :  { %1112 = vmatpush.bf16.msra.mxu2 %v3103_v33  ;;  %1125 = vmatpush.bf16.msra.mxu3 %v3113_v36 }
  0xae   :  { %v351_v10 = vpop.f32.mrf.mxu2 }
  0xaf   :  { %1087 = vmatpush.bf16.msra.mxu0 %v3100_v32  ;;  %1100 = vmatpush.bf16.msra.mxu1 %v3115_v37  ;;  %v364_v12 = vpop.f32.mrf.mxu3  ;;  %v3704_v10 = vperm.slane %v3388_v22, 3 }
  0xb0   :  { %1113 = vmatpush.bf16.msra.mxu2 %v3139_v45  ;;  %1126 = vmatpush.bf16.msra.mxu3 %v3149_v48 }
  0xb3   :  { %1088 = vmatpush.bf16.msra.mxu0 %v3136_v44  ;;  %1101 = vmatpush.bf16.msra.mxu1 %v3151_v49 }
  0xb4   :  { %1114 = vmatpush.bf16.msra.mxu2 %v3175_v57  ;;  %1127 = vmatpush.bf16.msra.mxu3 %v3185_v60 }
  0xb7   :  { %1089 = vmatpush.bf16.msra.mxu0 %v3172_v56  ;;  %1102 = vmatpush.bf16.msra.mxu1 %v3187_v61 }
  0xb8   :  { %1115 = vmatpush.bf16.msra.mxu2 %v3211_v6  ;;  %1128 = vmatpush.bf16.msra.mxu3 %v3215_v7 }
  0xbb   :  { %1090 = vmatpush.bf16.msra.mxu0 %v3208_v4  ;;  %1103 = vmatpush.bf16.msra.mxu1 %v3217_v8 }
  0xbc   :  { %1116 = vmatpush.bf16.msra.mxu2 %v3233_v14  ;;  %1129 = vmatpush.bf16.msra.mxu3 %v3237_v15 }
  0xbe   :  { %v585_v13 = vpop.f32.mrf.mxu0 }
  0xbf   :  { %1091 = vmatpush.bf16.msra.mxu0 %v3250_v20  ;;  %1104 = vmatpush.bf16.msra.mxu1 %v3261_v27  ;;  %v599_v16 = vpop.f32.mrf.mxu1  ;;  %v3400_v35 = vadd.f32 %v585_v13, %v3707_v29 }
  0xc0   :  { %1117 = vmatpush.bf16.msra.mxu2 %v3263_v28  ;;  %1130 = vmatpush.bf16.msra.mxu3 %v3272_v31  ;;  %v3404_v38 = vadd.f32 %v599_v16, %v3706_v30 }
  0xc3   :  { %1092 = vmatpush.bf16.msra.mxu0 %v3286_v39  ;;  %1105 = vmatpush.bf16.msra.mxu1 %v3297_v43 }
  0xc4   :  { %1118 = vmatpush.bf16.msra.mxu2 %v3299_v46  ;;  %1131 = vmatpush.bf16.msra.mxu3 %v3308_v51 }
  0xc6   :  { %v613_v18 = vpop.f32.mrf.mxu2  ;;  %v3390_v23 = vpop.f32.mrf.mxu0 }
  0xc7   :  { %v627_v17 = vpop.f32.mrf.mxu3  ;;  %3708 = vst [vmem:[#allocation3_spill] sm:$0xff] %v3390_v23  ;;  %v3392_v26 = vpop.f32.mrf.mxu1  ;;  %v3413_v55 = vadd.f32 %v613_v18, %v3705_v52 }
  0xc8   :  { %3709 = vst [vmem:[#allocation4_spill] sm:$0xff] %v3392_v26 }
  0xce   :  { %v3406_v40 = vpop.f32.mrf.mxu2 }
  0xcf   :  { %v3396_v34 = vpop.f32.mrf.mxu3  ;;  %3711 = vst [vmem:[#allocation6_spill] sm:$0xff] %v3406_v40 }
  0xd0   :  { %3710 = vst [vmem:[#allocation5_spill] sm:$0xff] %v3396_v34 }
 0x122   :  { %v834_v41 = vpop.f32.mrf.mxu0  ;;  %v847_v42 = vpop.f32.mrf.mxu1 }
 0x123   :  { %v877_v47 = vadd.f32 %v834_v41, %v3400_v35  ;;  %v878_v50 = vadd.f32 %v847_v42, %v3404_v38  ;;  %v3419_v41 = vadd.f32 %v627_v17, %v3704_v10 }
 0x125   :  { %v2379_v53 = vmul.f32 -1.442695, %v877_v47  ;;  %v2380_v54 = vmul.f32 -1.442695, %v878_v50 }
 0x127   :  { %2543 = vpow2.f32 %v2379_v53 }
 0x128   :  { %2545 = vpow2.f32 %v2380_v54 }
 0x129   :  { %v860_v58 = vpop.f32.mrf.mxu2  ;;  %v873_v59 = vpop.f32.mrf.mxu3 }
 0x12a   :  { %v879_v62 = vadd.f32 %v860_v58, %v3413_v55  ;;  %v836_v63 = vpop.f32.mrf.mxu0  ;;  %v849_v0 = vpop.f32.mrf.mxu1  ;;  %v880_v53 = vadd.f32 %v873_v59, %v3419_v41 }
 0x12c   :  { %v2381_v1 = vmul.f32 -1.442695, %v879_v62 }
 0x12d   :  { %v2544_v2 = vpop.eup %2543 }
 0x12e   :  { %v2546_v3 = vpop.eup %2545  ;;  %v890_v12 = vadd.f32 1.0, %v2544_v2  ;;  %2547 = vpow2.f32 %v2381_v1 }
 0x12f   :  { %v891_v13 = vadd.f32 1.0, %v2546_v3 }
 0x130   :  { %2549 = vrcp.f32 %v890_v12  ;;  %v904_v1 = vand.u32 2147483648, %v890_v12  ;;  %vm898_vm2 = vweird.f32 %v890_v12 }
 0x131   :  { %2551 = vrcp.f32 %v891_v13  ;;  %v862_v16 = vpop.f32.mrf.mxu2  ;;  %v875_v18 = vpop.f32.mrf.mxu3  ;;  %v919_v2 = vand.u32 2147483648, %v891_v13  ;;  %v917_v17 = vand.u32 2147483647, %v891_v13  ;;  %vm913_vm3 = vweird.f32 %v891_v13 }
 0x132   :  { %v902_v16 = vand.u32 2147483647, %v890_v12  ;;  %v905_v52 = vor.u32 1.1754944e-38, %v904_v1 }
 0x133   :  { %vm918_vm7 = vcmp.eq.f32.partialorder %v917_v17, 8.507059e+37 }
 0x134   :  { %v2548_v42 = vpop.eup %2547  ;;  %vm903_vm6 = vcmp.eq.f32.partialorder %v902_v16, 8.507059e+37 }
 0x135   :  { %v892_v47 = vadd.f32 1.0, %v2548_v42 }
 0x136   :  { %v2550_v50 = vpop.eup %2549 }
 0x137   :  { %v2552_v54 = vpop.eup %2551  ;;  %v894_v58 = vmul.f32 %v2550_v50, %v890_v12  ;;  %2553 = vrcp.f32 %v892_v47  ;;  %vm899_vm0 = vweird.f32 %v2550_v50  ;;  %v934_v1 = vand.u32 2147483648, %v892_v47 }
 0x138   :  { %v909_v62 = vmul.f32 %v2552_v54, %v891_v13  ;;  %2555 = vtanh.f32 %v880_v53  ;;  %vm914_vm1 = vweird.f32 %v2552_v54  ;;  %vm900_vm4 = vmor %vm898_vm2, %vm899_vm0  ;;  %vm928_vm9 = vweird.f32 %v892_v47 }
 0x139   :  { %v895_v63 = vsub.f32 1.0, %v894_v58  ;;  %vm915_vm5 = vmor %vm913_vm3, %vm914_vm1  ;;  %v920_v58 = vor.u32 1.1754944e-38, %v919_v2  ;;  %v935_v16 = vor.u32 1.1754944e-38, %v934_v1 }
 0x13a   :  { %v910_v0 = vsub.f32 1.0, %v909_v62 }
 0x13b   :  { %v896_v3 = vmul.f32 %v2550_v50, %v895_v63 }
 0x13c   :  { %v911_v18 = vmul.f32 %v2552_v54, %v910_v0 }
 0x13d   :  { %v2554_v10 = vpop.eup %2553  ;;  %v897_v42 = vadd.f32 %v2550_v50, %v896_v3 }
 0x13e   :  { %v924_v59 = vmul.f32 %v2554_v10, %v892_v47  ;;  %v912_v30 = vadd.f32 %v2552_v54, %v911_v18  ;;  %v2556_v53 = vpop.eup %2555  ;;  %vm929_vm8 = vweird.f32 %v2554_v10 }
 0x13f   :  { %v901_v62 = vsel %vm900_vm4, %v2550_v50, %v897_v42  ;;  %v932_v50 = vand.u32 2147483647, %v892_v47  ;;  %vm930_vm10 = vmor %vm928_vm9, %vm929_vm8 }
 0x140   :  { %v925_v29 = vsub.f32 1.0, %v924_v59  ;;  %v906_v63 = vsel %vm903_vm6, %v905_v52, %v901_v62  ;;  %v916_v34 = vsel %vm915_vm5, %v2552_v54, %v912_v30 }
 0x141   :  { %v921_v0 = vsel %vm918_vm7, %v920_v58, %v916_v34  ;;  %v940_v40 = vmul.f32 %v2556_v53, %v906_v63  ;;  %vm933_vm11 = vcmp.eq.f32.partialorder %v932_v50, 8.507059e+37 }
 0x142   :  { %v926_v26 = vmul.f32 %v2554_v10, %v925_v29  ;;  %v939_v3 = vmul.f32 %v921_v0, %v3357_v9 }
 0x144   :  { %v3423_v12 = vadd.f32 %v940_v40, %v939_v3  ;;  %v927_v13 = vadd.f32 %v2554_v10, %v926_v26 }
 0x146   :  { %2557 = vtanh.f32 %v3423_v12  ;;  %v931_v2 = vsel %vm930_vm10, %v2554_v10, %v927_v13 }
 0x147   :  { %v936_v52 = vsel %vm933_vm11, %v935_v16, %v931_v2 }
 0x14c   :  { %v2558_v30 = vpop.eup %2557 }
 0x14d   :  { %v943_v34 = vmul.f32 %v2558_v30, %v936_v52 }
 0x14f   :  { %944 = vst [vmem:[#allocation2] sm:$0x3] %v943_v34  ;;  %v945_v29 = vpack.c.bf16 %v943_v34, %v943_v34 }
 0x151   :  { %954 = vmatmul.bf16.vlgmr.msrb.gmra.mxu0 %v945_v29  ;;  %967 = vmatmul.bf16.vlgmr.msrb.gmra.mxu1 %v945_v29 }
 0x152   :  { %980 = vmatmul.bf16.vlgmr.msrb.gmra.mxu2 %v945_v29  ;;  %993 = vmatmul.bf16.vlgmr.msrb.gmra.mxu3 %v945_v29 }
 0x153   :  { %1224 = vmatpush.bf16.msrb.mxu0 %v3034_v5  ;;  %1237 = vmatpush.bf16.msrb.mxu1 %v3045_v11 }
 0x154   :  { %1250 = vmatpush.bf16.msrb.mxu2 %v3068_v21  ;;  %1263 = vmatpush.bf16.msrb.mxu3 %v3077_v24 }
 0x157   :  { %1225 = vmatpush.bf16.msrb.mxu0 %v3066_v19  ;;  %1238 = vmatpush.bf16.msrb.mxu1 %v3079_v25 }
 0x158   :  { %1251 = vmatpush.bf16.msrb.mxu2 %v3103_v33  ;;  %1264 = vmatpush.bf16.msrb.mxu3 %v3113_v36 }
 0x15b   :  { %1226 = vmatpush.bf16.msrb.mxu0 %v3100_v32  ;;  %1239 = vmatpush.bf16.msrb.mxu1 %v3115_v37 }
 0x15c   :  { %1252 = vmatpush.bf16.msrb.mxu2 %v3139_v45  ;;  %1265 = vmatpush.bf16.msrb.mxu3 %v3149_v48 }
 0x15f   :  { %1227 = vmatpush.bf16.msrb.mxu0 %v3136_v44  ;;  %1240 = vmatpush.bf16.msrb.mxu1 %v3151_v49 }
 0x160   :  { %1253 = vmatpush.bf16.msrb.mxu2 %v3175_v57  ;;  %1266 = vmatpush.bf16.msrb.mxu3 %v3185_v60 }
 0x163   :  { %1228 = vmatpush.bf16.msrb.mxu0 %v3172_v56  ;;  %1241 = vmatpush.bf16.msrb.mxu1 %v3187_v61 }
 0x164   :  { %1254 = vmatpush.bf16.msrb.mxu2 %v3211_v6  ;;  %1267 = vmatpush.bf16.msrb.mxu3 %v3215_v7 }
 0x167   :  { %1229 = vmatpush.bf16.msrb.mxu0 %v3208_v4  ;;  %1242 = vmatpush.bf16.msrb.mxu1 %v3217_v8 }
 0x168   :  { %1255 = vmatpush.bf16.msrb.mxu2 %v3233_v14  ;;  %1268 = vmatpush.bf16.msrb.mxu3 %v3237_v15 }
 0x16b   :  { %1230 = vmatpush.bf16.msrb.mxu0 %v3250_v20  ;;  %1243 = vmatpush.bf16.msrb.mxu1 %v3261_v27 }
 0x16c   :  { %1256 = vmatpush.bf16.msrb.mxu2 %v3263_v28  ;;  %1269 = vmatpush.bf16.msrb.mxu3 %v3272_v31 }
 0x16f   :  { %1231 = vmatpush.bf16.msrb.mxu0 %v3286_v39  ;;  %1244 = vmatpush.bf16.msrb.mxu1 %v3297_v43 }
 0x170   :  { %1257 = vmatpush.bf16.msrb.mxu2 %v3299_v46  ;;  %1270 = vmatpush.bf16.msrb.mxu3 %v3308_v51 }
 0x1ce   :  { %v955_v9 = vpop.f32.mrf.mxu0  ;;  %v968_v26 = vpop.f32.mrf.mxu1 }
 0x1cf   :  { %v1002_v40 = vrot.slane %v955_v9, 6  ;;  %v1003_v10 = vrot.slane %v968_v26, 6 }
 0x1d1   :  { %v1010_v47 = vadd.f32 %v1002_v40, %v3400_v35  ;;  %v1011_v54 = vadd.f32 %v1003_v10, %v3404_v38 }
 0x1d3   :  { %v2382_v18 = vmul.f32 -1.442695, %v1010_v47  ;;  %v2383_v17 = vmul.f32 -1.442695, %v1011_v54 }
 0x1d5   :  { %2559 = vpow2.f32 %v2382_v18  ;;  %v981_v42 = vpop.f32.mrf.mxu2  ;;  %v994_v59 = vpop.f32.mrf.mxu3 }
 0x1d6   :  { %2561 = vpow2.f32 %v2383_v17  ;;  %v1004_v58 = vrot.slane %v981_v42, 6  ;;  %v957_v62 = vpop.f32.mrf.mxu0  ;;  %v970_v53 = vpop.f32.mrf.mxu1  ;;  %v1005_v30 = vrot.slane %v994_v59, 6 }
 0x1d8   :  { %v1012_v63 = vadd.f32 %v1004_v58, %v3413_v55  ;;  %v1013_v9 = vadd.f32 %v1005_v30, %v3419_v41 }
 0x1da   :  { %v2384_v0 = vmul.f32 -1.442695, %v1012_v63 }
 0x1db   :  { %v2560_v3 = vpop.eup %2559 }
 0x1dc   :  { %v2562_v13 = vpop.eup %2561  ;;  %v1023_v1 = vadd.f32 1.0, %v2560_v3  ;;  %2563 = vpow2.f32 %v2384_v0 }
 0x1dd   :  { %v1024_v50 = vadd.f32 1.0, %v2562_v13  ;;  %v983_v2 = vpop.f32.mrf.mxu2  ;;  %v996_v16 = vpop.f32.mrf.mxu3 }
 0x1de   :  { %2565 = vrcp.f32 %v1023_v1  ;;  %v1037_v18 = vand.u32 2147483648, %v1023_v1  ;;  %v1035_v58 = vand.u32 2147483647, %v1023_v1  ;;  %vm1031_vm14 = vweird.f32 %v1023_v1 }
 0x1df   :  { %2567 = vrcp.f32 %v1024_v50  ;;  %v1052_v17 = vand.u32 2147483648, %v1024_v50  ;;  %v1050_v59 = vand.u32 2147483647, %v1024_v50  ;;  %vm1046_vm15 = vweird.f32 %v1024_v50 }
 0x1e0   :  { %v1038_v3 = vor.u32 1.1754944e-38, %v1037_v18  ;;  %v1073_v2 = vrot.slane %v3423_v12, 6  ;;  %vm1036_vm2 = vcmp.eq.f32.partialorder %v1035_v58, 8.507059e+37 }
 0x1e1   :  { %v1053_v16 = vor.u32 1.1754944e-38, %v1052_v17  ;;  %vm1051_vm3 = vcmp.eq.f32.partialorder %v1050_v59, 8.507059e+37 }
 0x1e2   :  { %v2564_v52 = vpop.eup %2563 }
 0x1e3   :  { %v1025_v34 = vadd.f32 1.0, %v2564_v52 }
 0x1e4   :  { %v2566_v29 = vpop.eup %2565 }
 0x1e5   :  { %v2568_v26 = vpop.eup %2567  ;;  %v1027_v40 = vmul.f32 %v2566_v29, %v1023_v1  ;;  %2569 = vrcp.f32 %v1025_v34  ;;  %vm1032_vm12 = vweird.f32 %v2566_v29  ;;  %v1067_v12 = vand.u32 2147483648, %v1025_v34 }
 0x1e6   :  { %v1042_v10 = vmul.f32 %v2568_v26, %v1024_v50  ;;  %2571 = vtanh.f32 %v1013_v9  ;;  %vm1047_vm13 = vweird.f32 %v2568_v26  ;;  %vm1033_vm0 = vmor %vm1031_vm14, %vm1032_vm12  ;;  %vm1061_vm5 = vweird.f32 %v1025_v34 }
 0x1e7   :  { %v1028_v47 = vsub.f32 1.0, %v1027_v40  ;;  %vm1048_vm1 = vmor %vm1046_vm15, %vm1047_vm13  ;;  %v1065_v18 = vand.u32 2147483647, %v1025_v34  ;;  %v1068_v17 = vor.u32 1.1754944e-38, %v1067_v12 }
 0x1e8   :  { %v1043_v54 = vsub.f32 1.0, %v1042_v10 }
 0x1e9   :  { %v1029_v42 = vmul.f32 %v2566_v29, %v1028_v47  ;;  %vm1066_vm7 = vcmp.eq.f32.partialorder %v1065_v18, 8.507059e+37 }
 0x1ea   :  { %v1044_v62 = vmul.f32 %v2568_v26, %v1043_v54 }
 0x1eb   :  { %v2570_v53 = vpop.eup %2569  ;;  %v1030_v63 = vadd.f32 %v2566_v29, %v1029_v42 }
 0x1ec   :  { %v1057_v0 = vmul.f32 %v2570_v53, %v1025_v34  ;;  %v1045_v13 = vadd.f32 %v2568_v26, %v1044_v62  ;;  %v2572_v52 = vpop.eup %2571  ;;  %vm1062_vm4 = vweird.f32 %v2570_v53 }
 0x1ed   :  { %v1034_v30 = vsel %vm1033_vm0, %v2566_v29, %v1030_v63  ;;  %vm1063_vm6 = vmor %vm1061_vm5, %vm1062_vm4 }
 0x1ee   :  { %v1058_v9 = vsub.f32 1.0, %v1057_v0  ;;  %v1039_v40 = vsel %vm1036_vm2, %v1038_v3, %v1034_v30  ;;  %v1049_v10 = vsel %vm1048_vm1, %v2568_v26, %v1045_v13 }
 0x1ef   :  { %v1054_v47 = vsel %vm1051_vm3, %v1053_v16, %v1049_v10  ;;  %v1076_v54 = vmul.f32 %v2572_v52, %v1039_v40 }
 0x1f0   :  { %v1075_v42 = vmul.f32 %v1073_v2, %v1054_v47  ;;  %v1059_v1 = vmul.f32 %v2570_v53, %v1058_v9 }
 0x1f2   :  { %v3463_v50 = vadd.f32 %v1076_v54, %v1075_v42  ;;  %v1060_v23 = vadd.f32 %v2570_v53, %v1059_v1 }
 0x1f4   :  { %2573 = vtanh.f32 %v3463_v50  ;;  %v1064_v29 = vsel %vm1063_vm6, %v2570_v53, %v1060_v23 }
 0x1f5   :  { %v1069_v26 = vsel %vm1066_vm7, %v1068_v17, %v1064_v29 }
 0x1fa   :  { %v2574_v58 = vpop.eup %2573 }
 0x1fb   :  { %v1079_v62 = vmul.f32 %v2574_v58, %v1069_v26 }
 0x1fd   :  { %1080 = vst [vmem:[#allocation2] sm:$0xc] %v1079_v62  ;;  %v1081_v59 = vpack.c.bf16 %v1079_v62, %v1079_v62 }
 0x1ff   :  { %v1083_v63 = vrot.slane %v1081_v59, 1 }
 0x201   :  { %1093 = vmatmul.bf16.vlgmr.msra.gmra.mxu0 %v1083_v63  ;;  %1106 = vmatmul.bf16.vlgmr.msra.gmra.mxu1 %v1083_v63 }
 0x202   :  { %1119 = vmatmul.bf16.vlgmr.msra.gmra.mxu2 %v1083_v63  ;;  %1132 = vmatmul.bf16.vlgmr.msra.gmra.mxu3 %v1083_v63 }
 0x203   :  { %1363 = vmatpush.bf16.msra.mxu0 %v3034_v5  ;;  %1376 = vmatpush.bf16.msra.mxu1 %v3045_v11 }
 0x204   :  { %1389 = vmatpush.bf16.msra.mxu2 %v3068_v21  ;;  %1402 = vmatpush.bf16.msra.mxu3 %v3077_v24 }
 0x207   :  { %1364 = vmatpush.bf16.msra.mxu0 %v3066_v19  ;;  %1377 = vmatpush.bf16.msra.mxu1 %v3079_v25 }
 0x208   :  { %1390 = vmatpush.bf16.msra.mxu2 %v3103_v33  ;;  %1403 = vmatpush.bf16.msra.mxu3 %v3113_v36 }
 0x20b   :  { %1365 = vmatpush.bf16.msra.mxu0 %v3100_v32  ;;  %1378 = vmatpush.bf16.msra.mxu1 %v3115_v37 }
 0x20c   :  { %1391 = vmatpush.bf16.msra.mxu2 %v3139_v45  ;;  %1404 = vmatpush.bf16.msra.mxu3 %v3149_v48 }
 0x20f   :  { %1366 = vmatpush.bf16.msra.mxu0 %v3136_v44  ;;  %1379 = vmatpush.bf16.msra.mxu1 %v3151_v49 }
 0x210   :  { %1392 = vmatpush.bf16.msra.mxu2 %v3175_v57  ;;  %1405 = vmatpush.bf16.msra.mxu3 %v3185_v60 }
 0x213   :  { %1367 = vmatpush.bf16.msra.mxu0 %v3172_v56  ;;  %1380 = vmatpush.bf16.msra.mxu1 %v3187_v61 }
 0x214   :  { %1393 = vmatpush.bf16.msra.mxu2 %v3211_v6  ;;  %1406 = vmatpush.bf16.msra.mxu3 %v3215_v7 }
 0x217   :  { %1368 = vmatpush.bf16.msra.mxu0 %v3208_v4  ;;  %1381 = vmatpush.bf16.msra.mxu1 %v3217_v8 }
 0x218   :  { %1394 = vmatpush.bf16.msra.mxu2 %v3233_v14  ;;  %1407 = vmatpush.bf16.msra.mxu3 %v3237_v15 }
 0x21b   :  { %1369 = vmatpush.bf16.msra.mxu0 %v3250_v20  ;;  %1382 = vmatpush.bf16.msra.mxu1 %v3261_v27 }
 0x21c   :  { %1395 = vmatpush.bf16.msra.mxu2 %v3263_v28  ;;  %1408 = vmatpush.bf16.msra.mxu3 %v3272_v31 }
 0x21f   :  { %1370 = vmatpush.bf16.msra.mxu0 %v3286_v39  ;;  %1383 = vmatpush.bf16.msra.mxu1 %v3297_v43 }
 0x220   :  { %1396 = vmatpush.bf16.msra.mxu2 %v3299_v46  ;;  %1409 = vmatpush.bf16.msra.mxu3 %v3308_v51 }
 0x27e   :  { %v1094_v23 = vpop.f32.mrf.mxu0  ;;  %v1107_v34 = vpop.f32.mrf.mxu1 }
 0x27f   :  { %v1141_v53 = vrot.slane %v1094_v23, 4  ;;  %v1142_v0 = vrot.slane %v1107_v34, 4 }
 0x281   :  { %v1149_v3 = vadd.f32 %v1141_v53, %v3400_v35  ;;  %v1150_v13 = vadd.f32 %v1142_v0, %v3404_v38 }
 0x283   :  { %v2385_v2 = vmul.f32 -1.442695, %v1149_v3  ;;  %v2386_v16 = vmul.f32 -1.442695, %v1150_v13 }
 0x285   :  { %2575 = vpow2.f32 %v2385_v2  ;;  %v1120_v30 = vpop.f32.mrf.mxu2  ;;  %v1133_v52 = vpop.f32.mrf.mxu3 }
 0x286   :  { %2577 = vpow2.f32 %v2386_v16  ;;  %v1143_v9 = vrot.slane %v1120_v30, 4  ;;  %v1096_v40 = vpop.f32.mrf.mxu0  ;;  %v1109_v10 = vpop.f32.mrf.mxu1  ;;  %v1144_v58 = vrot.slane %v1133_v52, 4 }
 0x288   :  { %v1151_v47 = vadd.f32 %v1143_v9, %v3413_v55  ;;  %v1152_v63 = vadd.f32 %v1144_v58, %v3419_v41 }
 0x28a   :  { %v2387_v54 = vmul.f32 -1.442695, %v1151_v47 }
 0x28b   :  { %v2576_v42 = vpop.eup %2575 }
 0x28c   :  { %v2578_v1 = vpop.eup %2577  ;;  %v1162_v12 = vadd.f32 1.0, %v2576_v42  ;;  %2579 = vpow2.f32 %v2387_v54 }
 0x28d   :  { %v1163_v18 = vadd.f32 1.0, %v2578_v1  ;;  %v1122_v29 = vpop.f32.mrf.mxu2  ;;  %v1135_v17 = vpop.f32.mrf.mxu3  ;;  %v1212_v1 = vrot.slane %v3463_v50, 6 }
 0x28e   :  { %2581 = vrcp.f32 %v1162_v12  ;;  %v1176_v13 = vand.u32 2147483648, %v1162_v12  ;;  %v1174_v30 = vand.u32 2147483647, %v1162_v12  ;;  %vm1170_vm10 = vweird.f32 %v1162_v12 }
 0x28f   :  { %2583 = vrcp.f32 %v1163_v18  ;;  %v1191_v2 = vand.u32 2147483648, %v1163_v18  ;;  %v1189_v52 = vand.u32 2147483647, %v1163_v18  ;;  %vm1185_vm11 = vweird.f32 %v1163_v18 }
 0x290   :  { %v1177_v54 = vor.u32 1.1754944e-38, %v1176_v13  ;;  %vm1175_vm14 = vcmp.eq.f32.partialorder %v1174_v30, 8.507059e+37 }
 0x291   :  { %v1192_v29 = vor.u32 1.1754944e-38, %v1191_v2  ;;  %vm1190_vm15 = vcmp.eq.f32.partialorder %v1189_v52, 8.507059e+37 }
 0x292   :  { %v2580_v26 = vpop.eup %2579 }
 0x293   :  { %v1164_v62 = vadd.f32 1.0, %v2580_v26 }
 0x294   :  { %v2582_v59 = vpop.eup %2581 }
 0x295   :  { %v2584_v23 = vpop.eup %2583  ;;  %v1166_v34 = vmul.f32 %v2582_v59, %v1162_v12  ;;  %2585 = vrcp.f32 %v1164_v62  ;;  %vm1171_vm8 = vweird.f32 %v2582_v59  ;;  %v1206_v50 = vand.u32 2147483648, %v1164_v62 }
 0x296   :  { %v1181_v53 = vmul.f32 %v2584_v23, %v1163_v18  ;;  %2587 = vtanh.f32 %v1152_v63  ;;  %vm1186_vm9 = vweird.f32 %v2584_v23  ;;  %vm1172_vm12 = vmor %vm1170_vm10, %vm1171_vm8  ;;  %vm1200_vm1 = vweird.f32 %v1164_v62 }
 0x297   :  { %v1167_v0 = vsub.f32 1.0, %v1166_v34  ;;  %vm1187_vm13 = vmor %vm1185_vm11, %vm1186_vm9  ;;  %v1204_v13 = vand.u32 2147483647, %v1164_v62  ;;  %v1207_v2 = vor.u32 1.1754944e-38, %v1206_v50 }
 0x298   :  { %v1182_v3 = vsub.f32 1.0, %v1181_v53 }
 0x299   :  { %v1168_v16 = vmul.f32 %v2582_v59, %v1167_v0  ;;  %vm1205_vm3 = vcmp.eq.f32.partialorder %v1204_v13, 8.507059e+37 }
 0x29a   :  { %v1183_v9 = vmul.f32 %v2584_v23, %v1182_v3 }
 0x29b   :  { %v2586_v40 = vpop.eup %2585  ;;  %v1169_v10 = vadd.f32 %v2582_v59, %v1168_v16 }
 0x29c   :  { %v1196_v47 = vmul.f32 %v2586_v40, %v1164_v62  ;;  %v1184_v42 = vadd.f32 %v2584_v23, %v1183_v9  ;;  %v2588_v58 = vpop.eup %2587  ;;  %vm1201_vm0 = vweird.f32 %v2586_v40 }
 0x29d   :  { %v1173_v17 = vsel %vm1172_vm12, %v2582_v59, %v1169_v10  ;;  %vm1202_vm2 = vmor %vm1200_vm1, %vm1201_vm0 }
 0x29e   :  { %v1197_v26 = vsub.f32 1.0, %v1196_v47  ;;  %v1178_v63 = vsel %vm1175_vm14, %v1177_v54, %v1173_v17  ;;  %v1188_v34 = vsel %vm1187_vm13, %v2584_v23, %v1184_v42 }
 0x29f   :  { %v1193_v53 = vsel %vm1190_vm15, %v1192_v29, %v1188_v34  ;;  %v1215_v0 = vmul.f32 %v2588_v58, %v1178_v63 }
 0x2a0   :  { %v1214_v3 = vmul.f32 %v1212_v1, %v1193_v53  ;;  %v1198_v12 = vmul.f32 %v2586_v40, %v1197_v26 }
 0x2a2   :  { %v3503_v18 = vadd.f32 %v1215_v0, %v1214_v3  ;;  %v1199_v16 = vadd.f32 %v2586_v40, %v1198_v12 }
 0x2a4   :  { %2589 = vtanh.f32 %v3503_v18  ;;  %v1203_v59 = vsel %vm1202_vm2, %v2586_v40, %v1199_v16 }
 0x2a5   :  { %v1208_v23 = vsel %vm1205_vm3, %v1207_v2, %v1203_v59 }
 0x2aa   :  { %v2590_v30 = vpop.eup %2589 }
 0x2ab   :  { %v1218_v9 = vmul.f32 %v2590_v30, %v1208_v23 }
 0x2ad   :  { %1219 = vst [vmem:[#allocation2] sm:$0x30] %v1218_v9  ;;  %v1220_v52 = vpack.c.bf16 %v1218_v9, %v1218_v9 }
 0x2af   :  { %v1222_v10 = vrot.slane %v1220_v52, 2 }
 0x2b1   :  { %1232 = vmatmul.bf16.vlgmr.msrb.gmra.mxu0 %v1222_v10  ;;  %1245 = vmatmul.bf16.vlgmr.msrb.gmra.mxu1 %v1222_v10 }
 0x2b2   :  { %1258 = vmatmul.bf16.vlgmr.msrb.gmra.mxu2 %v1222_v10  ;;  %1271 = vmatmul.bf16.vlgmr.msrb.gmra.mxu3 %v1222_v10 }
 0x2b3   :  { %1487 = vmatpush.bf16.msrb.mxu0 %v3034_v5  ;;  %1500 = vmatpush.bf16.msrb.mxu1 %v3045_v11 }
 0x2b4   :  { %1513 = vmatpush.bf16.msrb.mxu2 %v3068_v21  ;;  %1526 = vmatpush.bf16.msrb.mxu3 %v3077_v24 }
 0x2b7   :  { %1488 = vmatpush.bf16.msrb.mxu0 %v3066_v19  ;;  %1501 = vmatpush.bf16.msrb.mxu1 %v3079_v25 }
 0x2b8   :  { %1514 = vmatpush.bf16.msrb.mxu2 %v3103_v33  ;;  %1527 = vmatpush.bf16.msrb.mxu3 %v3113_v36 }
 0x2bb   :  { %1489 = vmatpush.bf16.msrb.mxu0 %v3100_v32  ;;  %1502 = vmatpush.bf16.msrb.mxu1 %v3115_v37 }
 0x2bc   :  { %1515 = vmatpush.bf16.msrb.mxu2 %v3139_v45  ;;  %1528 = vmatpush.bf16.msrb.mxu3 %v3149_v48 }
 0x2bf   :  { %1490 = vmatpush.bf16.msrb.mxu0 %v3136_v44  ;;  %1503 = vmatpush.bf16.msrb.mxu1 %v3151_v49 }
 0x2c0   :  { %1516 = vmatpush.bf16.msrb.mxu2 %v3175_v57  ;;  %1529 = vmatpush.bf16.msrb.mxu3 %v3185_v60 }
 0x2c3   :  { %1491 = vmatpush.bf16.msrb.mxu0 %v3172_v56  ;;  %1504 = vmatpush.bf16.msrb.mxu1 %v3187_v61 }
 0x2c4   :  { %1517 = vmatpush.bf16.msrb.mxu2 %v3211_v6  ;;  %1530 = vmatpush.bf16.msrb.mxu3 %v3215_v7 }
 0x2c7   :  { %1492 = vmatpush.bf16.msrb.mxu0 %v3208_v4  ;;  %1505 = vmatpush.bf16.msrb.mxu1 %v3217_v8 }
 0x2c8   :  { %1518 = vmatpush.bf16.msrb.mxu2 %v3233_v14  ;;  %1531 = vmatpush.bf16.msrb.mxu3 %v3237_v15 }
 0x2cb   :  { %1493 = vmatpush.bf16.msrb.mxu0 %v3250_v20  ;;  %1506 = vmatpush.bf16.msrb.mxu1 %v3261_v27 }
 0x2cc   :  { %1519 = vmatpush.bf16.msrb.mxu2 %v3263_v28  ;;  %1532 = vmatpush.bf16.msrb.mxu3 %v3272_v31 }
 0x2cf   :  { %1494 = vmatpush.bf16.msrb.mxu0 %v3286_v39  ;;  %1507 = vmatpush.bf16.msrb.mxu1 %v3297_v43 }
 0x2d0   :  { %1520 = vmatpush.bf16.msrb.mxu2 %v3299_v46  ;;  %1533 = vmatpush.bf16.msrb.mxu3 %v3308_v51 }
 0x32e   :  { %v1233_v62 = vpop.f32.mrf.mxu0  ;;  %v1246_v40 = vpop.f32.mrf.mxu1 }
 0x32f   :  { %v1280_v47 = vrot.slane %v1233_v62, 2  ;;  %v1281_v54 = vrot.slane %v1246_v40, 2 }
 0x331   :  { %v1288_v42 = vadd.f32 %v1280_v47, %v3400_v35  ;;  %v1289_v1 = vadd.f32 %v1281_v54, %v3404_v38 }
 0x333   :  { %v2388_v29 = vmul.f32 -1.442695, %v1288_v42  ;;  %v2389_v17 = vmul.f32 -1.442695, %v1289_v1 }
 0x335   :  { %2591 = vpow2.f32 %v2388_v29  ;;  %v1259_v58 = vpop.f32.mrf.mxu2  ;;  %v1272_v26 = vpop.f32.mrf.mxu3 }
 0x336   :  { %2593 = vpow2.f32 %v2389_v17  ;;  %v1282_v63 = vrot.slane %v1259_v58, 2  ;;  %v1235_v34 = vpop.f32.mrf.mxu0  ;;  %v1248_v53 = vpop.f32.mrf.mxu1  ;;  %v1283_v38 = vrot.slane %v1272_v26, 2 }
 0x337   :  { %v1351_v53 = vrot.slane %v3503_v18, 6 }
 0x338   :  { %v1290_v0 = vadd.f32 %v1282_v63, %v3413_v55  ;;  %v1291_v9 = vadd.f32 %v1283_v38, %v3419_v41 }
 0x33a   :  { %v2390_v3 = vmul.f32 -1.442695, %v1290_v0 }
 0x33b   :  { %v2592_v12 = vpop.eup %2591 }
 0x33c   :  { %v2594_v16 = vpop.eup %2593  ;;  %v1301_v50 = vadd.f32 1.0, %v2592_v12  ;;  %2595 = vpow2.f32 %v2390_v3 }
 0x33d   :  { %v1302_v13 = vadd.f32 1.0, %v2594_v16  ;;  %v1261_v35 = vpop.f32.mrf.mxu2  ;;  %v1274_v59 = vpop.f32.mrf.mxu3 }
 0x33e   :  { %2597 = vrcp.f32 %v1301_v50  ;;  %v1315_v47 = vand.u32 2147483648, %v1301_v50  ;;  %v1313_v1 = vand.u32 2147483647, %v1301_v50  ;;  %vm1309_vm6 = vweird.f32 %v1301_v50 }
 0x33f   :  { %2599 = vrcp.f32 %v1302_v13  ;;  %v1330_v54 = vand.u32 2147483648, %v1302_v13  ;;  %v1328_v17 = vand.u32 2147483647, %v1302_v13  ;;  %vm1324_vm7 = vweird.f32 %v1302_v13 }
 0x340   :  { %v1316_v63 = vor.u32 1.1754944e-38, %v1315_v47  ;;  %vm1314_vm10 = vcmp.eq.f32.partialorder %v1313_v1, 8.507059e+37  ;;  %v3713_v1 = vld [vmem:[#allocation3_spill] sm:$0xff] }
 0x341   :  { %v1331_v0 = vor.u32 1.1754944e-38, %v1330_v54  ;;  %vm1329_vm11 = vcmp.eq.f32.partialorder %v1328_v17, 8.507059e+37  ;;  %v3714_v17 = vperm.slane %v3388_v22, 1 }
 0x342   :  { %v2596_v2 = vpop.eup %2595 }
 0x343   :  { %v1303_v30 = vadd.f32 1.0, %v2596_v2 }
 0x344   :  { %v2598_v23 = vpop.eup %2597 }
 0x345   :  { %v2600_v52 = vpop.eup %2599  ;;  %v1305_v10 = vmul.f32 %v2598_v23, %v1301_v50  ;;  %2601 = vrcp.f32 %v1303_v30  ;;  %vm1310_vm4 = vweird.f32 %v2598_v23  ;;  %v1345_v18 = vand.u32 2147483648, %v1303_v30 }
 0x346   :  { %v1320_v55 = vmul.f32 %v2600_v52, %v1302_v13  ;;  %2603 = vtanh.f32 %v1291_v9  ;;  %vm1325_vm5 = vweird.f32 %v2600_v52  ;;  %vm1311_vm8 = vmor %vm1309_vm6, %vm1310_vm4  ;;  %vm1339_vm13 = vweird.f32 %v1303_v30 }
 0x347   :  { %v1306_v62 = vsub.f32 1.0, %v1305_v10  ;;  %vm1326_vm9 = vmor %vm1324_vm7, %vm1325_vm5 }
 0x348   :  { %v1321_v40 = vsub.f32 1.0, %v1320_v55  ;;  %v1343_v55 = vand.u32 2147483647, %v1303_v30 }
 0x349   :  { %v1307_v42 = vmul.f32 %v2598_v23, %v1306_v62  ;;  %v1346_v62 = vor.u32 1.1754944e-38, %v1345_v18 }
 0x34a   :  { %v1322_v29 = vmul.f32 %v2600_v52, %v1321_v40  ;;  %vm1344_vm15 = vcmp.eq.f32.partialorder %v1343_v55, 8.507059e+37 }
 0x34b   :  { %v2602_v58 = vpop.eup %2601  ;;  %v1308_v26 = vadd.f32 %v2598_v23, %v1307_v42 }
 0x34c   :  { %v1335_v41 = vmul.f32 %v2602_v58, %v1303_v30  ;;  %v1323_v34 = vadd.f32 %v2600_v52, %v1322_v29  ;;  %v2604_v12 = vpop.eup %2603  ;;  %vm1340_vm12 = vweird.f32 %v2602_v58  ;;  %v3712_v30 = vperm.slane %v3388_v22, 0 }
 0x34d   :  { %v1312_v3 = vsel %vm1311_vm8, %v2598_v23, %v1308_v26  ;;  %vm1341_vm14 = vmor %vm1339_vm13, %vm1340_vm12 }
 0x34e   :  { %v1336_v16 = vsub.f32 1.0, %v1335_v41  ;;  %v1317_v35 = vsel %vm1314_vm10, %v1316_v63, %v1312_v3  ;;  %v1327_v59 = vsel %vm1326_vm9, %v2600_v52, %v1323_v34  ;;  %v3581_v29 = vadd.f32 %v3713_v1, %v3712_v30 }
 0x34f   :  { %v1332_v38 = vsel %vm1329_vm11, %v1331_v0, %v1327_v59  ;;  %v1354_v2 = vmul.f32 %v2604_v12, %v1317_v35  ;;  %v3716_v12 = vperm.slane %v3388_v22, 2 }
 0x350   :  { %v1353_v9 = vmul.f32 %v1351_v53, %v1332_v38  ;;  %v1337_v50 = vmul.f32 %v2602_v58, %v1336_v16  ;;  %v3717_v16 = vld [vmem:[#allocation6_spill] sm:$0xff] }
 0x351   :  { %v3593_v35 = vadd.f32 %v3717_v16, %v3716_v12 }
 0x352   :  { %v3543_v13 = vadd.f32 %v1354_v2, %v1353_v9  ;;  %v1338_v10 = vadd.f32 %v2602_v58, %v1337_v50 }
 0x354   :  { %2605 = vtanh.f32 %v3543_v13  ;;  %v1342_v23 = vsel %vm1341_vm14, %v2602_v58, %v1338_v10  ;;  %v3715_v58 = vld [vmem:[#allocation4_spill] sm:$0xff] }
 0x355   :  { %v1347_v52 = vsel %vm1344_vm15, %v1346_v62, %v1342_v23  ;;  %v3586_v26 = vadd.f32 %v3715_v58, %v3714_v17 }
 0x35a   :  { %v2606_v40 = vpop.eup %2605 }
 0x35b   :  { %v1357_v47 = vmul.f32 %v2606_v40, %v1347_v52 }
 0x35d   :  { %1358 = vst [vmem:[#allocation2] sm:$0xc0] %v1357_v47  ;;  %v1359_v54 = vpack.c.bf16 %v1357_v47, %v1357_v47 }
 0x35f   :  { %v1361_v42 = vrot.slane %v1359_v54, 3  ;;  %v3718_v54 = vperm.slane %v3388_v22, 3 }
 0x361   :  { %1371 = vmatmul.bf16.vlgmr.msra.gmra.mxu0 %v1361_v42  ;;  %1384 = vmatmul.bf16.vlgmr.msra.gmra.mxu1 %v1361_v42 }
 0x362   :  { %1397 = vmatmul.bf16.vlgmr.msra.gmra.mxu2 %v1361_v42  ;;  %1410 = vmatmul.bf16.vlgmr.msra.gmra.mxu3 %v1361_v42  ;;  %v3719_v42 = vld [vmem:[#allocation5_spill] sm:$0xff] }
 0x363   :  { %1626 = vmatpush.bf16.msra.mxu0 %v3034_v5  ;;  %1639 = vmatpush.bf16.msra.mxu1 %v3045_v11  ;;  %v3599_v30 = vadd.f32 %v3719_v42, %v3718_v54 }
 0x364   :  { %1652 = vmatpush.bf16.msra.mxu2 %v3068_v21  ;;  %1665 = vmatpush.bf16.msra.mxu3 %v3077_v24 }
 0x367   :  { %1627 = vmatpush.bf16.msra.mxu0 %v3066_v19  ;;  %1640 = vmatpush.bf16.msra.mxu1 %v3079_v25 }
 0x368   :  { %1653 = vmatpush.bf16.msra.mxu2 %v3103_v33  ;;  %1666 = vmatpush.bf16.msra.mxu3 %v3113_v36 }
 0x36b   :  { %1628 = vmatpush.bf16.msra.mxu0 %v3100_v32  ;;  %1641 = vmatpush.bf16.msra.mxu1 %v3115_v37 }
 0x36c   :  { %1654 = vmatpush.bf16.msra.mxu2 %v3139_v45  ;;  %1667 = vmatpush.bf16.msra.mxu3 %v3149_v48 }
 0x36f   :  { %1629 = vmatpush.bf16.msra.mxu0 %v3136_v44  ;;  %1642 = vmatpush.bf16.msra.mxu1 %v3151_v49 }
 0x370   :  { %1655 = vmatpush.bf16.msra.mxu2 %v3175_v57  ;;  %1668 = vmatpush.bf16.msra.mxu3 %v3185_v60 }
 0x373   :  { %1630 = vmatpush.bf16.msra.mxu0 %v3172_v56  ;;  %1643 = vmatpush.bf16.msra.mxu1 %v3187_v61 }
 0x374   :  { %1656 = vmatpush.bf16.msra.mxu2 %v3211_v6  ;;  %1669 = vmatpush.bf16.msra.mxu3 %v3215_v7 }
 0x377   :  { %1631 = vmatpush.bf16.msra.mxu0 %v3208_v4  ;;  %1644 = vmatpush.bf16.msra.mxu1 %v3217_v8 }
 0x378   :  { %1657 = vmatpush.bf16.msra.mxu2 %v3233_v14  ;;  %1670 = vmatpush.bf16.msra.mxu3 %v3237_v15 }
 0x37b   :  { %1632 = vmatpush.bf16.msra.mxu0 %v3250_v20  ;;  %1645 = vmatpush.bf16.msra.mxu1 %v3261_v27 }
 0x37c   :  { %1658 = vmatpush.bf16.msra.mxu2 %v3263_v28  ;;  %1671 = vmatpush.bf16.msra.mxu3 %v3272_v31 }
 0x37f   :  { %1633 = vmatpush.bf16.msra.mxu0 %v3286_v39  ;;  %1646 = vmatpush.bf16.msra.mxu1 %v3297_v43 }
 0x380   :  { %1659 = vmatpush.bf16.msra.mxu2 %v3299_v46  ;;  %1672 = vmatpush.bf16.msra.mxu3 %v3308_v51 }
 0x3de   :  { %v1372_v41 = vpop.f32.mrf.mxu0  ;;  %v1385_v63 = vpop.f32.mrf.mxu1 }
 0x3df   :  { %v1415_v34 = vadd.f32 %v1372_v41, %v3581_v29  ;;  %v1416_v53 = vadd.f32 %v1385_v63, %v3586_v26 }
 0x3e1   :  { %v2391_v0 = vmul.f32 -1.442695, %v1415_v34  ;;  %v2392_v3 = vmul.f32 -1.442695, %v1416_v53 }
 0x3e3   :  { %2607 = vpow2.f32 %v2391_v0 }
 0x3e4   :  { %2609 = vpow2.f32 %v2392_v3 }
 0x3e5   :  { %v1398_v59 = vpop.f32.mrf.mxu2  ;;  %v1411_v38 = vpop.f32.mrf.mxu3 }
 0x3e6   :  { %v1417_v2 = vadd.f32 %v1398_v59, %v3593_v35  ;;  %v1374_v9 = vpop.f32.mrf.mxu0  ;;  %v1387_v50 = vpop.f32.mrf.mxu1  ;;  %v1418_v58 = vadd.f32 %v1411_v38, %v3599_v30 }
 0x3e8   :  { %v2393_v10 = vmul.f32 -1.442695, %v1417_v2 }
 0x3e9   :  { %v2608_v18 = vpop.eup %2607 }
 0x3ea   :  { %v2610_v55 = vpop.eup %2609  ;;  %v1428_v23 = vadd.f32 1.0, %v2608_v18  ;;  %2611 = vpow2.f32 %v2393_v10 }
 0x3eb   :  { %v1429_v62 = vadd.f32 1.0, %v2610_v55 }
 0x3ec   :  { %2613 = vrcp.f32 %v1428_v23  ;;  %v1442_v3 = vand.u32 2147483648, %v1428_v23  ;;  %v1440_v59 = vand.u32 2147483647, %v1428_v23  ;;  %vm1436_vm2 = vweird.f32 %v1428_v23 }
 0x3ed   :  { %2615 = vrcp.f32 %v1429_v62  ;;  %v1400_v40 = vpop.f32.mrf.mxu2  ;;  %v1413_v52 = vpop.f32.mrf.mxu3  ;;  %v1457_v12 = vand.u32 2147483648, %v1429_v62  ;;  %v1455_v2 = vand.u32 2147483647, %v1429_v62  ;;  %vm1451_vm3 = vweird.f32 %v1429_v62 }
 0x3ee   :  { %v1443_v10 = vor.u32 1.1754944e-38, %v1442_v3  ;;  %vm1441_vm6 = vcmp.eq.f32.partialorder %v1440_v59, 8.507059e+37  ;;  %v1478_v52 = vrot.slane %v3543_v13, 6 }
 0x3ef   :  { %v1458_v55 = vor.u32 1.1754944e-38, %v1457_v12  ;;  %vm1456_vm7 = vcmp.eq.f32.partialorder %v1455_v2, 8.507059e+37 }
 0x3f0   :  { %v2612_v47 = vpop.eup %2611 }
 0x3f1   :  { %v1430_v1 = vadd.f32 1.0, %v2612_v47 }
 0x3f2   :  { %v2614_v17 = vpop.eup %2613 }
 0x3f3   :  { %v2616_v41 = vpop.eup %2615  ;;  %v1432_v63 = vmul.f32 %v2614_v17, %v1428_v23  ;;  %2617 = vrcp.f32 %v1430_v1  ;;  %vm1437_vm0 = vweird.f32 %v2614_v17  ;;  %v1472_v3 = vand.u32 2147483648, %v1430_v1 }
 0x3f4   :  { %v1447_v34 = vmul.f32 %v2616_v41, %v1429_v62  ;;  %2619 = vtanh.f32 %v1418_v58  ;;  %vm1452_vm1 = vweird.f32 %v2616_v41  ;;  %vm1438_vm4 = vmor %vm1436_vm2, %vm1437_vm0  ;;  %vm1466_vm9 = vweird.f32 %v1430_v1 }
 0x3f5   :  { %v1433_v53 = vsub.f32 1.0, %v1432_v63  ;;  %vm1453_vm5 = vmor %vm1451_vm3, %vm1452_vm1  ;;  %v1473_v12 = vor.u32 1.1754944e-38, %v1472_v3 }
 0x3f6   :  { %v1448_v0 = vsub.f32 1.0, %v1447_v34 }
 0x3f7   :  { %v1434_v16 = vmul.f32 %v2614_v17, %v1433_v53 }
 0x3f8   :  { %v1449_v22 = vmul.f32 %v2616_v41, %v1448_v0 }
 0x3f9   :  { %v2618_v9 = vpop.eup %2617  ;;  %v1435_v50 = vadd.f32 %v2614_v17, %v1434_v16 }
 0x3fa   :  { %v1462_v38 = vmul.f32 %v2618_v9, %v1430_v1  ;;  %v1450_v18 = vadd.f32 %v2616_v41, %v1449_v22  ;;  %v2620_v47 = vpop.eup %2619  ;;  %vm1467_vm8 = vweird.f32 %v2618_v9 }
 0x3fb   :  { %v1439_v40 = vsel %vm1438_vm4, %v2614_v17, %v1435_v50  ;;  %v1470_v17 = vand.u32 2147483647, %v1430_v1  ;;  %vm1468_vm10 = vmor %vm1466_vm9, %vm1467_vm8 }
 0x3fc   :  { %v1463_v54 = vsub.f32 1.0, %v1462_v38  ;;  %v1444_v42 = vsel %vm1441_vm6, %v1443_v10, %v1439_v40  ;;  %v1454_v58 = vsel %vm1453_vm5, %v2616_v41, %v1450_v18 }
 0x3fd   :  { %v1459_v63 = vsel %vm1456_vm7, %v1458_v55, %v1454_v58  ;;  %v1481_v34 = vmul.f32 %v2620_v47, %v1444_v42  ;;  %vm1471_vm11 = vcmp.eq.f32.partialorder %v1470_v17, 8.507059e+37 }
 0x3fe   :  { %v1464_v53 = vmul.f32 %v2618_v9, %v1463_v54  ;;  %v1480_v23 = vmul.f32 %v1478_v52, %v1459_v63 }
 0x400   :  { %v3603_v62 = vadd.f32 %v1481_v34, %v1480_v23  ;;  %v1465_v0 = vadd.f32 %v2618_v9, %v1464_v53 }
 0x402   :  { %2621 = vtanh.f32 %v3603_v62  ;;  %v1469_v13 = vsel %vm1468_vm10, %v2618_v9, %v1465_v0  ;;  %v1614_v47 = vrot.slane %v3603_v62, 6 }
 0x403   :  { %v1474_v41 = vsel %vm1471_vm11, %v1473_v12, %v1469_v13 }
 0x408   :  { %v2622_v16 = vpop.eup %2621 }
 0x409   :  { %v1484_v59 = vmul.f32 %v2622_v16, %v1474_v41 }
 0x40b   :  { %1485 = vst [vmem:[#allocation2 + $0x8] sm:$0x3] %v1484_v59  ;;  %v1486_v22 = vpack.c.bf16 %v1484_v59, %v1484_v59 }
 0x40d   :  { %1495 = vmatmul.bf16.vlgmr.msrb.gmra.mxu0 %v1486_v22  ;;  %1508 = vmatmul.bf16.vlgmr.msrb.gmra.mxu1 %v1486_v22 }
 0x40e   :  { %1521 = vmatmul.bf16.vlgmr.msrb.gmra.mxu2 %v1486_v22  ;;  %1534 = vmatmul.bf16.vlgmr.msrb.gmra.mxu3 %v1486_v22 }
 0x40f   :  { %1765 = vmatpush.bf16.msrb.mxu0 %v3034_v5  ;;  %1778 = vmatpush.bf16.msrb.mxu1 %v3045_v11 }
 0x410   :  { %1791 = vmatpush.bf16.msrb.mxu2 %v3068_v21  ;;  %1804 = vmatpush.bf16.msrb.mxu3 %v3077_v24 }
 0x413   :  { %1766 = vmatpush.bf16.msrb.mxu0 %v3066_v19  ;;  %1779 = vmatpush.bf16.msrb.mxu1 %v3079_v25 }
 0x414   :  { %1792 = vmatpush.bf16.msrb.mxu2 %v3103_v33  ;;  %1805 = vmatpush.bf16.msrb.mxu3 %v3113_v36 }
 0x417   :  { %1767 = vmatpush.bf16.msrb.mxu0 %v3100_v32  ;;  %1780 = vmatpush.bf16.msrb.mxu1 %v3115_v37 }
 0x418   :  { %1793 = vmatpush.bf16.msrb.mxu2 %v3139_v45  ;;  %1806 = vmatpush.bf16.msrb.mxu3 %v3149_v48 }
 0x41b   :  { %1768 = vmatpush.bf16.msrb.mxu0 %v3136_v44  ;;  %1781 = vmatpush.bf16.msrb.mxu1 %v3151_v49 }
 0x41c   :  { %1794 = vmatpush.bf16.msrb.mxu2 %v3175_v57  ;;  %1807 = vmatpush.bf16.msrb.mxu3 %v3185_v60 }
 0x41f   :  { %1769 = vmatpush.bf16.msrb.mxu0 %v3172_v56  ;;  %1782 = vmatpush.bf16.msrb.mxu1 %v3187_v61 }
 0x420   :  { %1795 = vmatpush.bf16.msrb.mxu2 %v3211_v6  ;;  %1808 = vmatpush.bf16.msrb.mxu3 %v3215_v7 }
 0x423   :  { %1770 = vmatpush.bf16.msrb.mxu0 %v3208_v4  ;;  %1783 = vmatpush.bf16.msrb.mxu1 %v3217_v8 }
 0x424   :  { %1796 = vmatpush.bf16.msrb.mxu2 %v3233_v14  ;;  %1809 = vmatpush.bf16.msrb.mxu3 %v3237_v15 }
 0x427   :  { %1771 = vmatpush.bf16.msrb.mxu0 %v3250_v20  ;;  %1784 = vmatpush.bf16.msrb.mxu1 %v3261_v27 }
 0x428   :  { %1797 = vmatpush.bf16.msrb.mxu2 %v3263_v28  ;;  %1810 = vmatpush.bf16.msrb.mxu3 %v3272_v31 }
 0x42b   :  { %1772 = vmatpush.bf16.msrb.mxu0 %v3286_v39  ;;  %1785 = vmatpush.bf16.msrb.mxu1 %v3297_v43 }
 0x42c   :  { %1798 = vmatpush.bf16.msrb.mxu2 %v3299_v46  ;;  %1811 = vmatpush.bf16.msrb.mxu3 %v3308_v51 }
 0x48a   :  { %v1496_v5 = vpop.f32.mrf.mxu0  ;;  %v1509_v11 = vpop.f32.mrf.mxu1 }
 0x48b   :  { %v1543_v19 = vrot.slane %v1496_v5, 6  ;;  %v1544_v21 = vrot.slane %v1509_v11, 6 }
 0x48d   :  { %v1551_v24 = vadd.f32 %v1543_v19, %v3581_v29  ;;  %v1552_v25 = vadd.f32 %v1544_v21, %v3586_v26 }
 0x48f   :  { %v2394_v32 = vmul.f32 -1.442695, %v1551_v24  ;;  %v2395_v33 = vmul.f32 -1.442695, %v1552_v25 }
 0x491   :  { %2623 = vpow2.f32 %v2394_v32  ;;  %v1522_v36 = vpop.f32.mrf.mxu2  ;;  %v1535_v37 = vpop.f32.mrf.mxu3 }
 0x492   :  { %2625 = vpow2.f32 %v2395_v33  ;;  %v1545_v44 = vrot.slane %v1522_v36, 6  ;;  %v1498_v45 = vpop.f32.mrf.mxu0  ;;  %v1511_v48 = vpop.f32.mrf.mxu1  ;;  %v1546_v8 = vrot.slane %v1535_v37, 6 }
 0x494   :  { %v1553_v49 = vadd.f32 %v1545_v44, %v3593_v35  ;;  %v1554_v27 = vadd.f32 %v1546_v8, %v3599_v30 }
 0x496   :  { %v2396_v56 = vmul.f32 -1.442695, %v1553_v49 }
 0x497   :  { %v2624_v57 = vpop.eup %2623 }
 0x498   :  { %v2626_v60 = vpop.eup %2625  ;;  %v1564_v61 = vadd.f32 1.0, %v2624_v57  ;;  %2627 = vpow2.f32 %v2396_v56 }
 0x499   :  { %v1565_v4 = vadd.f32 1.0, %v2626_v60  ;;  %v1524_v6 = vpop.f32.mrf.mxu2  ;;  %v1537_v7 = vpop.f32.mrf.mxu3 }
 0x49a   :  { %2629 = vrcp.f32 %v1564_v61  ;;  %v1578_v51 = vand.u32 2147483648, %v1564_v61  ;;  %v1576_v9 = vand.u32 2147483647, %v1564_v61  ;;  %vm1572_vm14 = vweird.f32 %v1564_v61 }
 0x49b   :  { %2631 = vrcp.f32 %v1565_v4  ;;  %v1593_v1 = vand.u32 2147483648, %v1565_v4  ;;  %v1591_v38 = vand.u32 2147483647, %v1565_v4  ;;  %vm1587_vm15 = vweird.f32 %v1565_v4 }
 0x49c   :  { %v1579_v40 = vor.u32 1.1754944e-38, %v1578_v51  ;;  %vm1577_vm2 = vcmp.eq.f32.partialorder %v1576_v9, 8.507059e+37 }
 0x49d   :  { %v1594_v54 = vor.u32 1.1754944e-38, %v1593_v1  ;;  %vm1592_vm3 = vcmp.eq.f32.partialorder %v1591_v38, 8.507059e+37 }
 0x49e   :  { %v2628_v14 = vpop.eup %2627 }
 0x49f   :  { %v1566_v15 = vadd.f32 1.0, %v2628_v14 }
 0x4a0   :  { %v2630_v20 = vpop.eup %2629 }
 0x4a1   :  { %v2632_v28 = vpop.eup %2631  ;;  %v1568_v31 = vmul.f32 %v2630_v20, %v1564_v61  ;;  %2633 = vrcp.f32 %v1566_v15  ;;  %vm1573_vm12 = vweird.f32 %v2630_v20  ;;  %v1608_v62 = vand.u32 2147483648, %v1566_v15 }
 0x4a2   :  { %v1583_v39 = vmul.f32 %v2632_v28, %v1565_v4  ;;  %2635 = vtanh.f32 %v1554_v27  ;;  %vm1588_vm13 = vweird.f32 %v2632_v28  ;;  %vm1574_vm0 = vmor %vm1572_vm14, %vm1573_vm12  ;;  %vm1602_vm5 = vweird.f32 %v1566_v15 }
 0x4a3   :  { %v1569_v43 = vsub.f32 1.0, %v1568_v31  ;;  %vm1589_vm1 = vmor %vm1587_vm15, %vm1588_vm13  ;;  %v1606_v16 = vand.u32 2147483647, %v1566_v15  ;;  %v1609_v59 = vor.u32 1.1754944e-38, %v1608_v62 }
 0x4a4   :  { %v1584_v46 = vsub.f32 1.0, %v1583_v39 }
 0x4a5   :  { %v1570_v2 = vmul.f32 %v2630_v20, %v1569_v43  ;;  %vm1607_vm7 = vcmp.eq.f32.partialorder %v1606_v16, 8.507059e+37 }
 0x4a6   :  { %v1585_v50 = vmul.f32 %v2632_v28, %v1584_v46 }
 0x4a7   :  { %v2634_v10 = vpop.eup %2633  ;;  %v1571_v18 = vadd.f32 %v2630_v20, %v1570_v2 }
 0x4a8   :  { %v1598_v55 = vmul.f32 %v2634_v10, %v1566_v15  ;;  %v1586_v52 = vadd.f32 %v2632_v28, %v1585_v50  ;;  %v2636_v58 = vpop.eup %2635  ;;  %vm1603_vm4 = vweird.f32 %v2634_v10 }
 0x4a9   :  { %v1575_v42 = vsel %vm1574_vm0, %v2630_v20, %v1571_v18  ;;  %vm1604_vm6 = vmor %vm1602_vm5, %vm1603_vm4 }
 0x4aa   :  { %v1599_v63 = vsub.f32 1.0, %v1598_v55  ;;  %v1580_v34 = vsel %vm1577_vm2, %v1579_v40, %v1575_v42  ;;  %v1590_v53 = vsel %vm1589_vm1, %v2632_v28, %v1586_v52 }
 0x4ab   :  { %v1595_v23 = vsel %vm1592_vm3, %v1594_v54, %v1590_v53  ;;  %v1617_v0 = vmul.f32 %v2636_v58, %v1580_v34 }
 0x4ac   :  { %v1616_v3 = vmul.f32 %v1614_v47, %v1595_v23  ;;  %v1600_v17 = vmul.f32 %v2634_v10, %v1599_v63 }
 0x4ae   :  { %v3643_v13 = vadd.f32 %v1617_v0, %v1616_v3  ;;  %v1601_v12 = vadd.f32 %v2634_v10, %v1600_v17 }
 0x4b0   :  { %2637 = vtanh.f32 %v3643_v13  ;;  %v1605_v41 = vsel %vm1604_vm6, %v2634_v10, %v1601_v12  ;;  %v1753_v63 = vrot.slane %v3643_v13, 6 }
 0x4b1   :  { %v1610_v5 = vsel %vm1607_vm7, %v1609_v59, %v1605_v41 }
 0x4b6   :  { %v2638_v22 = vpop.eup %2637 }
 0x4b7   :  { %v1620_v11 = vmul.f32 %v2638_v22, %v1610_v5 }
 0x4b9   :  { %1621 = vst [vmem:[#allocation2 + $0x8] sm:$0xc] %v1620_v11  ;;  %v1622_v19 = vpack.c.bf16 %v1620_v11, %v1620_v11 }
 0x4bb   :  { %v1624_v21 = vrot.slane %v1622_v19, 1 }
 0x4bd   :  { %1634 = vmatmul.bf16.vlgmr.msra.gmra.mxu0 %v1624_v21  ;;  %1647 = vmatmul.bf16.vlgmr.msra.gmra.mxu1 %v1624_v21 }
 0x4be   :  { %1660 = vmatmul.bf16.vlgmr.msra.gmra.mxu2 %v1624_v21  ;;  %1673 = vmatmul.bf16.vlgmr.msra.gmra.mxu3 %v1624_v21 }
 0x53a   :  { %v1635_v24 = vpop.f32.mrf.mxu0  ;;  %v1648_v25 = vpop.f32.mrf.mxu1 }
 0x53b   :  { %v1682_v32 = vrot.slane %v1635_v24, 4  ;;  %v1683_v33 = vrot.slane %v1648_v25, 4 }
 0x53d   :  { %v1690_v36 = vadd.f32 %v1682_v32, %v3581_v29  ;;  %v1691_v37 = vadd.f32 %v1683_v33, %v3586_v26 }
 0x53f   :  { %v2397_v44 = vmul.f32 -1.442695, %v1690_v36  ;;  %v2398_v45 = vmul.f32 -1.442695, %v1691_v37  ;;  %v2539_v36 = vld [vmem:[%s3702_s9 + $0x38] sm:$0xff]  ;;  %v2538_v37 = vld [vmem:[%s3702_s9 + $0x30] sm:$0xff] }
 0x540   :  { %1971 = vmatpush.bf16.msra.mxu0 %v2539_v36 }
 0x541   :  { %2639 = vpow2.f32 %v2397_v44  ;;  %v1661_v48 = vpop.f32.mrf.mxu2  ;;  %v1674_v49 = vpop.f32.mrf.mxu3 }
 0x542   :  { %2641 = vpow2.f32 %v2398_v45  ;;  %v1684_v56 = vrot.slane %v1661_v48, 4  ;;  %v1637_v57 = vpop.f32.mrf.mxu0  ;;  %v1650_v60 = vpop.f32.mrf.mxu1  ;;  %v1685_v27 = vrot.slane %v1674_v49, 4 }
 0x544   :  { %v1692_v61 = vadd.f32 %v1684_v56, %v3593_v35  ;;  %v1693_v43 = vadd.f32 %v1685_v27, %v3599_v30  ;;  %1972 = vmatpush.bf16.msra.mxu0 %v2538_v37  ;;  %v2537_v56 = vld [vmem:[%s3702_s9 + $0x28] sm:$0xff] }
 0x546   :  { %v2399_v4 = vmul.f32 -1.442695, %v1692_v61 }
 0x547   :  { %v2640_v6 = vpop.eup %2639 }
 0x548   :  { %v2642_v7 = vpop.eup %2641  ;;  %v1703_v8 = vadd.f32 1.0, %v2640_v6  ;;  %2643 = vpow2.f32 %v2399_v4  ;;  %1973 = vmatpush.bf16.msra.mxu0 %v2537_v56  ;;  %v2536_v6 = vld [vmem:[%s3702_s9 + $0x20] sm:$0xff]  ;;  %v1900_v56 = vld [vmem:[#allocation2] sm:$0xff] }
 0x549   :  { %v1704_v14 = vadd.f32 1.0, %v2642_v7  ;;  %v1663_v15 = vpop.f32.mrf.mxu2  ;;  %v1676_v20 = vpop.f32.mrf.mxu3 }
 0x54a   :  { %2645 = vrcp.f32 %v1703_v8  ;;  %v1717_v50 = vand.u32 2147483648, %v1703_v8  ;;  %v1715_v18 = vand.u32 2147483647, %v1703_v8  ;;  %vm1711_vm10 = vweird.f32 %v1703_v8 }
 0x54b   :  { %2647 = vrcp.f32 %v1704_v14  ;;  %v1732_v38 = vand.u32 2147483648, %v1704_v14  ;;  %v1730_v40 = vand.u32 2147483647, %v1704_v14  ;;  %vm1726_vm11 = vweird.f32 %v1704_v14 }
 0x54c   :  { %v1718_v42 = vor.u32 1.1754944e-38, %v1717_v50  ;;  %vm1716_vm14 = vcmp.eq.f32.partialorder %v1715_v18, 8.507059e+37  ;;  %1974 = vmatpush.bf16.msra.mxu0 %v2536_v6 }
 0x54d   :  { %v1733_v34 = vor.u32 1.1754944e-38, %v1732_v38  ;;  %vm1731_vm15 = vcmp.eq.f32.partialorder %v1730_v40, 8.507059e+37 }
 0x54e   :  { %v2644_v28 = vpop.eup %2643 }
 0x54f   :  { %v1705_v31 = vadd.f32 1.0, %v2644_v28 }
 0x550   :  { %v2646_v39 = vpop.eup %2645 }
 0x551   :  { %v2648_v46 = vpop.eup %2647  ;;  %v1707_v51 = vmul.f32 %v2646_v39, %v1703_v8  ;;  %2649 = vrcp.f32 %v1705_v31  ;;  %vm1712_vm8 = vweird.f32 %v2646_v39  ;;  %v1747_v13 = vand.u32 2147483648, %v1705_v31 }
 0x552   :  { %v1722_v1 = vmul.f32 %v2648_v46, %v1704_v14  ;;  %2651 = vtanh.f32 %v1693_v43  ;;  %vm1727_vm9 = vweird.f32 %v2648_v46  ;;  %vm1713_vm12 = vmor %vm1711_vm10, %vm1712_vm8  ;;  %vm1741_vm1 = vweird.f32 %v1705_v31 }
 0x553   :  { %v1708_v2 = vsub.f32 1.0, %v1707_v51  ;;  %vm1728_vm13 = vmor %vm1726_vm11, %vm1727_vm9  ;;  %v1745_v5 = vand.u32 2147483647, %v1705_v31  ;;  %v1748_v19 = vor.u32 1.1754944e-38, %v1747_v13 }
 0x554   :  { %v1723_v9 = vsub.f32 1.0, %v1722_v1 }
 0x555   :  { %v1709_v10 = vmul.f32 %v2646_v39, %v1708_v2  ;;  %vm1746_vm3 = vcmp.eq.f32.partialorder %v1745_v5, 8.507059e+37  ;;  %v2533_v2 = vld [vmem:[%s3702_s9 + $0x8] sm:$0xff] }
 0x556   :  { %v1724_v55 = vmul.f32 %v2648_v46, %v1723_v9  ;;  %v2532_v9 = vld [vmem:[%s3702_s9] sm:$0xff] }
 0x557   :  { %v2650_v52 = vpop.eup %2649  ;;  %v1710_v47 = vadd.f32 %v2646_v39, %v1709_v10 }
 0x558   :  { %v1737_v54 = vmul.f32 %v2650_v52, %v1705_v31  ;;  %v1725_v58 = vadd.f32 %v2648_v46, %v1724_v55  ;;  %v2652_v23 = vpop.eup %2651  ;;  %vm1742_vm0 = vweird.f32 %v2650_v52  ;;  %v2534_v31 = vld [vmem:[%s3702_s9 + $0x10] sm:$0xff] }
 0x559   :  { %v1714_v53 = vsel %vm1713_vm12, %v2646_v39, %v1710_v47  ;;  %vm1743_vm2 = vmor %vm1741_vm1, %vm1742_vm0 }
 0x55a   :  { %v1738_v0 = vsub.f32 1.0, %v1737_v54  ;;  %v1719_v3 = vsel %vm1716_vm14, %v1718_v42, %v1714_v53  ;;  %v1729_v17 = vsel %vm1728_vm13, %v2648_v46, %v1725_v58 }
 0x55b   :  { %v1734_v12 = vsel %vm1731_vm15, %v1733_v34, %v1729_v17  ;;  %v1756_v62 = vmul.f32 %v2652_v23, %v1719_v3 }
 0x55c   :  { %v1755_v16 = vmul.f32 %v1753_v63, %v1734_v12  ;;  %v1739_v41 = vmul.f32 %v2650_v52, %v1738_v0 }
 0x55e   :  { %v3651_v59 = vadd.f32 %v1756_v62, %v1755_v16  ;;  %v1740_v22 = vadd.f32 %v2650_v52, %v1739_v41 }
 0x560   :  { %2653 = vtanh.f32 %v3651_v59  ;;  %v1744_v11 = vsel %vm1743_vm2, %v2650_v52, %v1740_v22  ;;  %v1892_v62 = vrot.slane %v3651_v59, 6 }
 0x561   :  { %v1749_v24 = vsel %vm1746_vm3, %v1748_v19, %v1744_v11 }
 0x566   :  { %v2654_v21 = vpop.eup %2653 }
 0x567   :  { %v1759_v25 = vmul.f32 %v2654_v21, %v1749_v24 }
 0x569   :  { %1760 = vst [vmem:[#allocation2 + $0x8] sm:$0x30] %v1759_v25  ;;  %v1761_v32 = vpack.c.bf16 %v1759_v25, %v1759_v25 }
 0x56b   :  { %v1763_v33 = vrot.slane %v1761_v32, 2 }
 0x56d   :  { %1773 = vmatmul.bf16.vlgmr.msrb.gmra.mxu0 %v1763_v33  ;;  %1786 = vmatmul.bf16.vlgmr.msrb.gmra.mxu1 %v1763_v33 }
 0x56e   :  { %1799 = vmatmul.bf16.vlgmr.msrb.gmra.mxu2 %v1763_v33  ;;  %1812 = vmatmul.bf16.vlgmr.msrb.gmra.mxu3 %v1763_v33 }
 0x5ea   :  { %v1774_v44 = vpop.f32.mrf.mxu0  ;;  %v1787_v45 = vpop.f32.mrf.mxu1 }
 0x5eb   :  { %v1821_v48 = vrot.slane %v1774_v44, 2  ;;  %v1822_v49 = vrot.slane %v1787_v45, 2 }
 0x5ed   :  { %v1829_v57 = vadd.f32 %v1821_v48, %v3581_v29  ;;  %v1830_v60 = vadd.f32 %v1822_v49, %v3586_v26  ;;  %v2535_v29 = vld [vmem:[%s3702_s9 + $0x18] sm:$0xff] }
 0x5ee   :  { %1975 = vmatpush.bf16.msra.mxu0 %v2535_v29 }
 0x5ef   :  { %v2400_v61 = vmul.f32 -1.442695, %v1829_v57  ;;  %v2401_v4 = vmul.f32 -1.442695, %v1830_v60 }
 0x5f1   :  { %2655 = vpow2.f32 %v2400_v61  ;;  %v1800_v7 = vpop.f32.mrf.mxu2  ;;  %v1813_v8 = vpop.f32.mrf.mxu3  ;;  %v2542_v61 = vld [vmem:[%s3701_s10] ss:$0 sm:$0xff] }
 0x5f2   :  { %2657 = vpow2.f32 %v2401_v4  ;;  %v1823_v14 = vrot.slane %v1800_v7, 2  ;;  %v1776_v15 = vpop.f32.mrf.mxu0  ;;  %v1789_v20 = vpop.f32.mrf.mxu1  ;;  %1976 = vmatpush.bf16.msra.mxu0 %v2534_v31 }
 0x5f4   :  { %v1831_v26 = vadd.f32 %v1823_v14, %v3593_v35  ;;  %v1824_v35 = vrot.slane %v1813_v8, 2 }
 0x5f6   :  { %v2402_v27 = vmul.f32 -1.442695, %v1831_v26  ;;  %1977 = vmatpush.bf16.msra.mxu0 %v2533_v2  ;;  %v1832_v18 = vadd.f32 %v1824_v35, %v3599_v30 }
 0x5f7   :  { %v2656_v28 = vpop.eup %2655 }
 0x5f8   :  { %v2658_v39 = vpop.eup %2657  ;;  %v1842_v43 = vadd.f32 1.0, %v2656_v28  ;;  %2659 = vpow2.f32 %v2402_v27 }
 0x5f9   :  { %v1843_v46 = vadd.f32 1.0, %v2658_v39  ;;  %v1802_v51 = vpop.f32.mrf.mxu2  ;;  %v1815_v1 = vpop.f32.mrf.mxu3 }
 0x5fa   :  { %2661 = vrcp.f32 %v1842_v43  ;;  %1978 = vmatpush.bf16.msra.mxu0 %v2532_v9  ;;  %v1856_v42 = vand.u32 2147483648, %v1842_v43  ;;  %v1854_v34 = vand.u32 2147483647, %v1842_v43  ;;  %vm1850_vm6 = vweird.f32 %v1842_v43 }
 0x5fb   :  { %2663 = vrcp.f32 %v1843_v46  ;;  %v1871_v58 = vand.u32 2147483648, %v1843_v46  ;;  %v1869_v23 = vand.u32 2147483647, %v1843_v46  ;;  %vm1865_vm7 = vweird.f32 %v1843_v46 }
 0x5fc   :  { %v1857_v17 = vor.u32 1.1754944e-38, %v1856_v42  ;;  %vm1855_vm10 = vcmp.eq.f32.partialorder %v1854_v34, 8.507059e+37 }
 0x5fd   :  { %v1872_v16 = vor.u32 1.1754944e-38, %v1871_v58  ;;  %vm1870_vm11 = vcmp.eq.f32.partialorder %v1869_v23, 8.507059e+37 }
 0x5fe   :  { %v2660_v50 = vpop.eup %2659 }
 0x5ff   :  { %v1844_v38 = vadd.f32 1.0, %v2660_v50 }
 0x600   :  { %v2662_v10 = vpop.eup %2661 }
 0x601   :  { %v2664_v55 = vpop.eup %2663  ;;  %v1846_v40 = vmul.f32 %v2662_v10, %v1842_v43  ;;  %2665 = vrcp.f32 %v1844_v38  ;;  %vm1851_vm4 = vweird.f32 %v2662_v10  ;;  %v1886_v36 = vand.u32 2147483648, %v1844_v38 }
 0x602   :  { %v1861_v52 = vmul.f32 %v2664_v55, %v1843_v46  ;;  %2667 = vtanh.f32 %v1832_v18  ;;  %vm1866_vm5 = vweird.f32 %v2664_v55  ;;  %vm1852_vm8 = vmor %vm1850_vm6, %vm1851_vm4  ;;  %vm1880_vm13 = vweird.f32 %v1844_v38 }
 0x603   :  { %v1847_v47 = vsub.f32 1.0, %v1846_v40  ;;  %vm1867_vm9 = vmor %vm1865_vm7, %vm1866_vm5  ;;  %v1884_v59 = vand.u32 2147483647, %v1844_v38  ;;  %v1887_v44 = vor.u32 1.1754944e-38, %v1886_v36 }
 0x604   :  { %v1862_v54 = vsub.f32 1.0, %v1861_v52 }
 0x605   :  { %v1848_v63 = vmul.f32 %v2662_v10, %v1847_v47  ;;  %vm1885_vm15 = vcmp.eq.f32.partialorder %v1884_v59, 8.507059e+37 }
 0x606   :  { %v1863_v53 = vmul.f32 %v2664_v55, %v1862_v54 }
 0x607   :  { %v2666_v0 = vpop.eup %2665  ;;  %v1849_v3 = vadd.f32 %v2662_v10, %v1848_v63 }
 0x608   :  { %v1876_v30 = vmul.f32 %v2666_v0, %v1844_v38  ;;  %v1864_v12 = vadd.f32 %v2664_v55, %v1863_v53  ;;  %v2668_v22 = vpop.eup %2667  ;;  %vm1881_vm12 = vweird.f32 %v2666_v0 }
 0x609   :  { %v1853_v41 = vsel %vm1852_vm8, %v2662_v10, %v1849_v3  ;;  %vm1882_vm14 = vmor %vm1880_vm13, %vm1881_vm12 }
 0x60a   :  { %v1877_v13 = vsub.f32 1.0, %v1876_v30  ;;  %v1858_v5 = vsel %vm1855_vm10, %v1857_v17, %v1853_v41  ;;  %v1868_v11 = vsel %vm1867_vm9, %v2664_v55, %v1864_v12 }
 0x60b   :  { %v1873_v19 = vsel %vm1870_vm11, %v1872_v16, %v1868_v11  ;;  %v1895_v21 = vmul.f32 %v2668_v22, %v1858_v5 }
 0x60c   :  { %v1878_v24 = vmul.f32 %v2666_v0, %v1877_v13  ;;  %v1894_v25 = vmul.f32 %v1892_v62, %v1873_v19 }
 0x60e   :  { %v1896_v32 = vadd.f32 %v1895_v21, %v1894_v25  ;;  %v1879_v33 = vadd.f32 %v2666_v0, %v1878_v24 }
 0x610   :  { %2669 = vtanh.f32 %v1896_v32  ;;  %v1883_v37 = vsel %vm1882_vm14, %v2666_v0, %v1879_v33 }
 0x611   :  { %v1888_v48 = vsel %vm1885_vm15, %v1887_v44, %v1883_v37 }
 0x616   :  { %v2670_v45 = vpop.eup %2669 }
 0x617   :  { %v1898_v49 = vmul.f32 %v2670_v45, %v1888_v48 }
 0x619   :  { %1899 = vst [vmem:[#allocation2 + $0x8] sm:$0xc0] %v1898_v49 }
 0x620   :  { %v1901_v57 = vld [vmem:[#allocation2 + $0x8] sm:$0xff] }
 0x621   :  { %v1902_v60 = vpack.c.bf16 %v1901_v57, %v1900_v56 }
 0x623   :  { %1979 = vmatmul.bf16.vlgmr.msra.gmra.mxu0 %v1902_v60 }
 0x6a0   :  { %v1980_v4 = vpop.f32.mrf.mxu0 }
 0x6a1   :  { %v1981_v6 = vadd.f32 %v2542_v61, %v1980_v4 }
 0x6a3   :  { %1985 = vst [vmem:[%s3703_s11] sm:$0xff] %v1981_v6 }
 0x6a8   :  { %v1982_v7 = vpop.f32.mrf.mxu0 }
 0x6a9   :  { %v1983_v8 = vadd.f32 %v2542_v61, %v1982_v7 }
 0x6ab   :  { %1986 = vst [vmem:[%s3703_s11 + $0x8] sm:$0xff] %v1983_v8 }

</bundles_post_ra>
